<compile_context>
chip_gen: v6e
topology: v6e:2x2x1
jax: 0.10.0
libtpu: 0.0.40
codegen_flags: <defaults>
</compile_context>

<pallas_src>
import functools

import jax
import jax.numpy as jnp
from jax import lax
from jax.experimental import pallas as pl
from jax.experimental.pallas import tpu as pltpu

K = 3          # EmbedText conv1d kernel width ('same' padding = 1)
LANE = 128     # TPU lane width; L and C are zero-padded up to a multiple of this


def matching_kernel(sup_ref, tgt_ref, hots_ref, idx_ref, w_ref, b_ref,
                    preds_ref, nll_ref, xp_ref, *, num_classes, inv_bt):
    _, S, W, NC = sup_ref.shape          # supports block: [1, S, W, NC] (channels-last)
    T = tgt_ref.shape[1]
    LPAD = tgt_ref.shape[2]              # embedding dim padded to LANE multiple
    CPAD = hots_ref.shape[2]             # class dim padded to LANE multiple
    PAD = (K - 1) // 2
    SW = S * W

    x = sup_ref[0].astype(jnp.float32)                     # [S, W, NC]

    # --- 'same' padding along the width axis, done in-kernel via a VMEM scratch.
    xp_ref[...] = jnp.zeros((S, W + K - 1, NC), jnp.float32)
    xp_ref[:, PAD:PAD + W, :] = x

    # --- EmbedText conv as a single MXU matmul on the im2col slab.
    # taps[k][(s,w), n] = x[s, w + k - PAD, n]   (zero at the boundaries)
    taps = [xp_ref[:, k:k + W, :].reshape(SW, NC) for k in range(K)]
    xcat = jnp.concatenate(taps, axis=1)                    # [S*W, K*NC]
    act = jnp.dot(xcat, w_ref[...].astype(jnp.float32),
                  preferred_element_type=jnp.float32)       # [S*W, LPAD]
    act = jnp.maximum(act + b_ref[...].astype(jnp.float32), 0.0)

    # mean-pool over width -> support embeddings [S, LPAD] (padded cols stay exactly 0)
    sup_emb = jnp.sum(act.reshape(S, W, LPAD), axis=1) * (1.0 / W)

    # --- PairCosineSim(normalize=True): rsqrt on clamped squared norms (EUP slot).
    eps = 1e-8
    s_sq = jnp.sum(sup_emb * sup_emb, axis=-1, keepdims=True)
    s_norm = sup_emb * lax.rsqrt(jnp.maximum(s_sq, eps * eps))

    tgt = tgt_ref[0].astype(jnp.float32)                    # [T, LPAD] raw targets (fce=False)
    t_sq = jnp.sum(tgt * tgt, axis=-1, keepdims=True)
    t_norm = tgt * lax.rsqrt(jnp.maximum(t_sq, eps * eps))

    sim = lax.dot_general(t_norm, s_norm, (((1,), (1,)), ((), ())),
                          preferred_element_type=jnp.float32)   # [T, S]

    # --- Attn: softmax over supports, weighted sum of support one-hot labels.
    m = jnp.max(sim, axis=-1, keepdims=True)
    e = jnp.exp(sim - m)
    att = e * pl.reciprocal(jnp.sum(e, axis=-1, keepdims=True), approx=True)

    hots = hots_ref[0].astype(jnp.float32)                  # [S, CPAD] (padded cols are 0)
    preds = jnp.dot(att, hots, preferred_element_type=jnp.float32)   # [T, CPAD]
    preds_ref[0] = preds.astype(preds_ref.dtype)            # lane-dense (128) store

    # --- per-batch cross-entropy partial, masked to the real classes.
    cls = lax.broadcasted_iota(jnp.int32, (T, CPAD), 1)
    valid = cls < num_classes
    pm = jnp.where(valid, preds, -1e30)
    mx = jnp.max(pm, axis=-1, keepdims=True)
    lse = mx + jnp.log(jnp.sum(jnp.exp(pm - mx), axis=-1, keepdims=True))   # [T, 1]
    onehot = (cls == idx_ref[0]).astype(jnp.float32)        # idx_ref[0]: [T, 1] int32
    picked = jnp.sum(onehot * preds, axis=-1, keepdims=True)
    nll = jnp.sum(lse - picked)                              # scalar: sum_t CE for this batch
    nll_ref[...] = (nll * inv_bt).reshape(1, 1, 1)           # already scaled by 1/(B*T)


def matching_network_forward(supports_x, supports_hots, targets_x, targets_hots,
                             target_cat_indices, conv_w, conv_b):
    """fce=False forward.  conv_w: [L, NC, K] (PyTorch Conv1d layout), conv_b: [L]."""
    del targets_hots  # unused by the reference forward (loss uses target_cat_indices)
    B, S, NC, W = supports_x.shape
    T = targets_x.shape[1]
    C = supports_hots.shape[2]
    L = conv_w.shape[0]
    assert NC * W == L, "fce=False: raw target dim must equal embedding dim"

    LPAD = LANE * pl.cdiv(L, LANE)
    CPAD = LANE * pl.cdiv(C, LANE)

    # Layout plumbing in the wrapper (no compute hoisted):
    sup_t = jnp.transpose(supports_x, (0, 1, 3, 2)).astype(jnp.float32)     # [B,S,W,NC]
    tgt_flat = targets_x.reshape(B, T, NC * W).astype(jnp.float32)
    tgt_pad = jnp.pad(tgt_flat, ((0, 0), (0, 0), (0, LPAD - L)))            # [B,T,LPAD]
    hots_pad = jnp.pad(supports_hots.astype(jnp.float32),
                       ((0, 0), (0, 0), (0, CPAD - C)))                     # [B,S,CPAD]
    idx3 = target_cat_indices.astype(jnp.int32).reshape(B, T, 1)
    w2 = jnp.transpose(conv_w, (2, 1, 0)).reshape(K * NC, L).astype(jnp.float32)
    w2 = jnp.pad(w2, ((0, 0), (0, LPAD - L)))                               # [K*NC, LPAD]
    b2 = jnp.pad(conv_b.astype(jnp.float32), (0, LPAD - L)).reshape(1, LPAD)

    kernel = functools.partial(matching_kernel, num_classes=C, inv_bt=1.0 / (B * T))

    preds_pad, nll_part = pl.pallas_call(
        kernel,
        grid=(B,),
        in_specs=[
            pl.BlockSpec((1, S, W, NC), lambda b: (b, 0, 0, 0)),   # supports (channels-last)
            pl.BlockSpec((1, T, LPAD), lambda b: (b, 0, 0)),       # raw targets, lane-padded
            pl.BlockSpec((1, S, CPAD), lambda b: (b, 0, 0)),       # support one-hots, padded
            pl.BlockSpec((1, T, 1), lambda b: (b, 0, 0)),          # target class indices
            pl.BlockSpec((K * NC, LPAD), lambda b: (0, 0)),        # conv weight (im2col form)
            pl.BlockSpec((1, LPAD), lambda b: (0, 0)),             # conv bias
        ],
        out_specs=(
            pl.BlockSpec((1, T, CPAD), lambda b: (b, 0, 0)),       # lane-dense preds
            pl.BlockSpec((1, 1, 1), lambda b: (b, 0, 0)),          # per-batch loss partial
        ),
        out_shape=(
            jax.ShapeDtypeStruct((B, T, CPAD), jnp.float32),
            jax.ShapeDtypeStruct((B, 1, 1), jnp.float32),
        ),
        scratch_shapes=[pltpu.VMEM((S, W + K - 1, NC), jnp.float32)],  # in-kernel 'same' pad
        compiler_params=pltpu.CompilerParams(
            dimension_semantics=("parallel",),
            vmem_limit_bytes=32 * 1024 * 1024,
        ),
    )(sup_t, tgt_pad, hots_pad, idx3, w2, b2)

    preds = preds_pad[:, :, :C]
    loss = jnp.sum(nll_part)          # B-way scalar sum (partials already carry 1/(B*T))
    return loss, preds


def _reference(supports_x, supports_hots, targets_x, target_cat_indices, conv_w, conv_b):
    """Pure-JAX reference of the same fce=False forward for a correctness check."""
    B, S, NC, W = supports_x.shape
    T = targets_x.shape[1]
    xpad = jnp.pad(supports_x, ((0, 0), (0, 0), (0, 0), (1, 1)))
    taps = jnp.stack([xpad[..., k:k + W] for k in range(K)], axis=3)   # [B,S,NC,K,W]
    conv = jnp.einsum('lnk,bsnkw->bslw', conv_w, taps) + conv_b[None, None, :, None]
    emb = jnp.maximum(conv, 0.0).mean(axis=-1)                         # [B,S,L]
    tgt = targets_x.reshape(B, T, -1)
    eps = 1e-8
    sn = emb / jnp.maximum(jnp.sqrt(jnp.sum(emb * emb, -1, keepdims=True)), eps)
    tn = tgt / jnp.maximum(jnp.sqrt(jnp.sum(tgt * tgt, -1, keepdims=True)), eps)
    sim = jnp.einsum('btd,bsd->bts', tn, sn)
    att = jax.nn.softmax(sim, axis=-1)
    preds = jnp.einsum('bts,bsc->btc', att, supports_hots.astype(jnp.float32))
    logp = jax.nn.log_softmax(preds, axis=-1)
    nll = -jnp.take_along_axis(logp, target_cat_indices[..., None].astype(jnp.int32), axis=-1)
    return jnp.sum(nll) / (B * T), preds


if __name__ == "__main__":
    key = jax.random.PRNGKey(0)
    k1, k2, k3, k4, k5 = jax.random.split(key, 5)

    B, S, T, NC, W, C = 2, 8, 4, 1, 28, 5        # small shapes consistent with the module
    layer_size = NC * W                          # = 28

    supports_x = jax.random.normal(k1, (B, S, NC, W), dtype=jnp.float32)
    targets_x = jax.random.normal(k2, (B, T, NC, W), dtype=jnp.float32)
    support_classes = jax.random.randint(k3, (B, S), 0, C)
    supports_hots = jax.nn.one_hot(support_classes, C, dtype=jnp.float32)
    target_cat_indices = jax.random.randint(k4, (B, T), 0, C).astype(jnp.int32)
    targets_hots = jax.nn.one_hot(target_cat_indices, C, dtype=jnp.float32)

    conv_w = 0.1 * jax.random.normal(k5, (layer_size, NC, K), dtype=jnp.float32)
    conv_b = 0.01 * jnp.ones((layer_size,), dtype=jnp.float32)

    loss, preds = matching_network_forward(
        supports_x, supports_hots, targets_x, targets_hots,
        target_cat_indices, conv_w, conv_b)
    jax.block_until_ready((loss, preds))

    assert preds.shape == (B, T, C) and loss.shape == ()

    loss_r, preds_r = _reference(supports_x, supports_hots, targets_x,
                                 target_cat_indices, conv_w, conv_b)
    jax.block_until_ready((loss_r, preds_r))
    assert bool(jnp.allclose(preds, preds_r, atol=2e-2, rtol=2e-2))
    assert bool(jnp.allclose(loss, loss_r, atol=2e-2, rtol=2e-2))

    print("KERNEL_OK")
</pallas_src>

<mosaic_0001>
module attributes {stable_mosaic.version = 11 : i64} {
  func.func @matching_kernel(%arg0: i32, %arg1: memref<1x8x28x1xf32, #tpu.memory_space<vmem>>, %arg2: memref<1x4x128xf32, #tpu.memory_space<vmem>>, %arg3: memref<1x8x128xf32, #tpu.memory_space<vmem>>, %arg4: memref<1x4x1xi32, #tpu.memory_space<vmem>>, %arg5: memref<3x128xf32, #tpu.memory_space<vmem>>, %arg6: memref<1x128xf32, #tpu.memory_space<vmem>>, %arg7: memref<1x4x128xf32, #tpu.memory_space<vmem>>, %arg8: memref<1x1x1xf32, #tpu.memory_space<vmem>>, %arg9: memref<8x30x1xf32, #tpu.memory_space<vmem>>) attributes {dimension_semantics = [#tpu.dimension_semantics<parallel>], iteration_bounds = array<i64: 2>, scalar_prefetch = 0 : i64, scratch_operands = 1 : i64, tpu.core_type = #tpu.core_type<tc>, window_params = [{transform_indices = @transform_0, window_bounds = array<i64: 1, 8, 28, 1>}, {transform_indices = @transform_1, window_bounds = array<i64: 1, 4, 128>}, {transform_indices = @transform_2, window_bounds = array<i64: 1, 8, 128>}, {transform_indices = @transform_3, window_bounds = array<i64: 1, 4, 1>}, {pipeline_mode = #tpu.pipeline_mode<synchronous>, transform_indices = @transform_4, window_bounds = array<i64: 3, 128>}, {pipeline_mode = #tpu.pipeline_mode<synchronous>, transform_indices = @transform_5, window_bounds = array<i64: 1, 128>}, {transform_indices = @transform_6, window_bounds = array<i64: 1, 4, 128>}, {transform_indices = @transform_7, window_bounds = array<i64: 1, 1, 1>}]} {
    %c0 = arith.constant 0 : index
    %c0_0 = arith.constant 0 : index
    %c0_1 = arith.constant 0 : index
    %c0_2 = arith.constant 0 : index
    %0 = vector.load %arg1[%c0, %c0_0, %c0_1, %c0_2] : memref<1x8x28x1xf32, #tpu.memory_space<vmem>>, vector<1x8x28x1xf32>
    %1 = vector.shape_cast %0 : vector<1x8x28x1xf32> to vector<8x28x1xf32>
    %cst = arith.constant 0.000000e+00 : f32
    %2 = vector.broadcast %cst : f32 to vector<8x30x1xf32>
    %c0_3 = arith.constant 0 : index
    %c0_4 = arith.constant 0 : index
    %c0_5 = arith.constant 0 : index
    %3 = vector.load %arg9[%c0_3, %c0_4, %c0_5] : memref<8x30x1xf32, #tpu.memory_space<vmem>>, vector<8x30x1xf32>
    tpu.vector_store %arg9[%c0_3, %c0_4, %c0_5], %2 {strides = array<i32>} : memref<8x30x1xf32, #tpu.memory_space<vmem>>, vector<8x30x1xf32>,
    %c0_6 = arith.constant 0 : index
    %c1 = arith.constant 1 : index
    %c0_7 = arith.constant 0 : index
    %4 = vector.load %arg9[%c0_6, %c1, %c0_7] : memref<8x30x1xf32, #tpu.memory_space<vmem>>, vector<8x28x1xf32>
    tpu.vector_store %arg9[%c0_6, %c1, %c0_7], %1 {strides = array<i32>} : memref<8x30x1xf32, #tpu.memory_space<vmem>>, vector<8x28x1xf32>,
    %c0_8 = arith.constant 0 : index
    %c0_9 = arith.constant 0 : index
    %c0_10 = arith.constant 0 : index
    %5 = vector.load %arg9[%c0_8, %c0_9, %c0_10] : memref<8x30x1xf32, #tpu.memory_space<vmem>>, vector<8x28x1xf32>
    %6 = vector.shape_cast %5 : vector<8x28x1xf32> to vector<224x1xf32>
    %c0_11 = arith.constant 0 : index
    %c1_12 = arith.constant 1 : index
    %c0_13 = arith.constant 0 : index
    %7 = vector.load %arg9[%c0_11, %c1_12, %c0_13] : memref<8x30x1xf32, #tpu.memory_space<vmem>>, vector<8x28x1xf32>
    %8 = vector.shape_cast %7 : vector<8x28x1xf32> to vector<224x1xf32>
    %c0_14 = arith.constant 0 : index
    %c2 = arith.constant 2 : index
    %c0_15 = arith.constant 0 : index
    %9 = vector.load %arg9[%c0_14, %c2, %c0_15] : memref<8x30x1xf32, #tpu.memory_space<vmem>>, vector<8x28x1xf32>
    %10 = vector.shape_cast %9 : vector<8x28x1xf32> to vector<224x1xf32>
    %11 = tpu.concatenate %6, %8, %10 in 1 : vector<224x1xf32>, vector<224x1xf32>, vector<224x1xf32> -> vector<224x3xf32>
    %c0_16 = arith.constant 0 : index
    %c0_17 = arith.constant 0 : index
    %12 = vector.load %arg5[%c0_16, %c0_17] : memref<3x128xf32, #tpu.memory_space<vmem>>, vector<3x128xf32>
    %cst_18 = arith.constant dense<0.000000e+00> : vector<224x128xf32>
    %13 = tpu.matmul %11, %12, %cst_18 {dimension_numbers = #tpu.dot_dimension_numbers<[1], [0], [0], [1], [0, 0, 1, 1], [], []>} : vector<224x3xf32>, vector<3x128xf32>, vector<224x128xf32> -> vector<224x128xf32>
    %c0_19 = arith.constant 0 : index
    %c0_20 = arith.constant 0 : index
    %14 = vector.load %arg6[%c0_19, %c0_20] : memref<1x128xf32, #tpu.memory_space<vmem>>, vector<1x128xf32>
    %15 = vector.broadcast %14 : vector<1x128xf32> to vector<224x128xf32>
    %16 = arith.addf %13, %15 : vector<224x128xf32>
    %cst_21 = arith.constant 0.000000e+00 : f32
    %17 = vector.broadcast %cst_21 : f32 to vector<224x128xf32>
    %18 = arith.maximumf %16, %17 : vector<224x128xf32>
    %19 = vector.shape_cast %18 : vector<224x128xf32> to vector<8x28x128xf32>
    %cst_22 = arith.constant dense<0.000000e+00> : vector<8x128xf32>
    %20 = vector.multi_reduction <add>, %19, %cst_22 [1] : vector<8x28x128xf32> to vector<8x128xf32>
    %cst_23 = arith.constant 0.0357142873 : f32
    %21 = vector.broadcast %cst_23 : f32 to vector<8x128xf32>
    %22 = arith.mulf %20, %21 : vector<8x128xf32>
    %23 = arith.mulf %22, %22 : vector<8x128xf32>
    %cst_24 = arith.constant dense<0.000000e+00> : vector<8xf32>
    %24 = vector.multi_reduction <add>, %23, %cst_24 [1] : vector<8x128xf32> to vector<8xf32>
    %25 = vector.shape_cast %24 : vector<8xf32> to vector<8x1xf32>
    %cst_25 = arith.constant 1.000000e-16 : f32
    %26 = vector.broadcast %cst_25 : f32 to vector<8x1xf32>
    %27 = arith.maximumf %25, %26 : vector<8x1xf32>
    %28 = math.rsqrt %27 : vector<8x1xf32>
    %29 = vector.broadcast %28 : vector<8x1xf32> to vector<8x128xf32>
    %30 = arith.mulf %22, %29 : vector<8x128xf32>
    %c0_26 = arith.constant 0 : index
    %c0_27 = arith.constant 0 : index
    %c0_28 = arith.constant 0 : index
    %31 = vector.load %arg2[%c0_26, %c0_27, %c0_28] : memref<1x4x128xf32, #tpu.memory_space<vmem>>, vector<1x4x128xf32>
    %32 = vector.shape_cast %31 : vector<1x4x128xf32> to vector<4x128xf32>
    %33 = arith.mulf %32, %32 : vector<4x128xf32>
    %cst_29 = arith.constant dense<0.000000e+00> : vector<4xf32>
    %34 = vector.multi_reduction <add>, %33, %cst_29 [1] : vector<4x128xf32> to vector<4xf32>
    %35 = vector.shape_cast %34 : vector<4xf32> to vector<4x1xf32>
    %cst_30 = arith.constant 1.000000e-16 : f32
    %36 = vector.broadcast %cst_30 : f32 to vector<4x1xf32>
    %37 = arith.maximumf %35, %36 : vector<4x1xf32>
    %38 = math.rsqrt %37 : vector<4x1xf32>
    %39 = vector.broadcast %38 : vector<4x1xf32> to vector<4x128xf32>
    %40 = arith.mulf %32, %39 : vector<4x128xf32>
    %cst_31 = arith.constant dense<0.000000e+00> : vector<4x8xf32>
    %41 = tpu.matmul %40, %30, %cst_31 {dimension_numbers = #tpu.dot_dimension_numbers<[1], [1], [0], [0], [0, 0, 1, 0], [], []>} : vector<4x128xf32>, vector<8x128xf32>, vector<4x8xf32> -> vector<4x8xf32>
    %cst_32 = arith.constant dense<0xFF800000> : vector<4xf32>
    %42 = vector.multi_reduction <maximumf>, %41, %cst_32 [1] : vector<4x8xf32> to vector<4xf32>
    %43 = vector.shape_cast %42 : vector<4xf32> to vector<4x1xf32>
    %44 = vector.broadcast %43 : vector<4x1xf32> to vector<4x8xf32>
    %45 = arith.subf %41, %44 : vector<4x8xf32>
    %46 = math.exp %45 : vector<4x8xf32>
    %cst_33 = arith.constant dense<0.000000e+00> : vector<4xf32>
    %47 = vector.multi_reduction <add>, %46, %cst_33 [1] : vector<4x8xf32> to vector<4xf32>
    %48 = vector.shape_cast %47 : vector<4xf32> to vector<4x1xf32>
    %49 = tpu.reciprocal %48 {approx = true} : vector<4x1xf32> -> vector<4x1xf32>
    %50 = vector.broadcast %49 : vector<4x1xf32> to vector<4x8xf32>
    %51 = arith.mulf %46, %50 : vector<4x8xf32>
    %c0_34 = arith.constant 0 : index
    %c0_35 = arith.constant 0 : index
    %c0_36 = arith.constant 0 : index
    %52 = vector.load %arg3[%c0_34, %c0_35, %c0_36] : memref<1x8x128xf32, #tpu.memory_space<vmem>>, vector<1x8x128xf32>
    %53 = vector.shape_cast %52 : vector<1x8x128xf32> to vector<8x128xf32>
    %cst_37 = arith.constant dense<0.000000e+00> : vector<4x128xf32>
    %54 = tpu.matmul %51, %53, %cst_37 {dimension_numbers = #tpu.dot_dimension_numbers<[1], [0], [0], [1], [0, 0, 1, 1], [], []>} : vector<4x8xf32>, vector<8x128xf32>, vector<4x128xf32> -> vector<4x128xf32>
    %c0_38 = arith.constant 0 : index
    %c0_39 = arith.constant 0 : index
    %c0_40 = arith.constant 0 : index
    %55 = vector.load %arg7[%c0_38, %c0_39, %c0_40] : memref<1x4x128xf32, #tpu.memory_space<vmem>>, vector<1x4x128xf32>
    %56 = vector.shape_cast %55 : vector<1x4x128xf32> to vector<4x128xf32>
    %57 = vector.shape_cast %54 : vector<4x128xf32> to vector<1x4x128xf32>
    tpu.vector_store %arg7[%c0_38, %c0_39, %c0_40], %57 {strides = array<i32>} : memref<1x4x128xf32, #tpu.memory_space<vmem>>, vector<1x4x128xf32>,
    %58 = tpu.iota {dimensions = array<i32: 1>} : vector<4x128xi32>
    %c5_i32 = arith.constant 5 : i32
    %59 = vector.broadcast %c5_i32 : i32 to vector<4x128xi32>
    %60 = arith.cmpi slt, %58, %59 : vector<4x128xi32>
    %cst_41 = arith.constant -1.000000e+30 : f32
    %61 = vector.broadcast %cst_41 : f32 to vector<4x128xf32>
    %62 = arith.select %60, %54, %61 : vector<4x128xi1>, vector<4x128xf32>
    %cst_42 = arith.constant dense<0xFF800000> : vector<4xf32>
    %63 = vector.multi_reduction <maximumf>, %62, %cst_42 [1] : vector<4x128xf32> to vector<4xf32>
    %64 = vector.shape_cast %63 : vector<4xf32> to vector<4x1xf32>
    %65 = vector.broadcast %64 : vector<4x1xf32> to vector<4x128xf32>
    %66 = arith.subf %62, %65 : vector<4x128xf32>
    %67 = math.exp %66 : vector<4x128xf32>
    %cst_43 = arith.constant dense<0.000000e+00> : vector<4xf32>
    %68 = vector.multi_reduction <add>, %67, %cst_43 [1] : vector<4x128xf32> to vector<4xf32>
    %69 = vector.shape_cast %68 : vector<4xf32> to vector<4x1xf32>
    %70 = math.log %69 : vector<4x1xf32>
    %71 = arith.addf %64, %70 : vector<4x1xf32>
    %c0_44 = arith.constant 0 : index
    %c0_45 = arith.constant 0 : index
    %c0_46 = arith.constant 0 : index
    %72 = vector.load %arg4[%c0_44, %c0_45, %c0_46] : memref<1x4x1xi32, #tpu.memory_space<vmem>>, vector<1x4x1xi32>
    %73 = vector.shape_cast %72 : vector<1x4x1xi32> to vector<4x1xi32>
    %74 = vector.broadcast %73 : vector<4x1xi32> to vector<4x128xi32>
    %75 = arith.cmpi eq, %58, %74 : vector<4x128xi32>
    %76 = arith.extui %75 : vector<4x128xi1> to vector<4x128xi32>
    %77 = arith.sitofp %76 : vector<4x128xi32> to vector<4x128xf32>
    %78 = arith.mulf %77, %54 : vector<4x128xf32>
    %cst_47 = arith.constant dense<0.000000e+00> : vector<4xf32>
    %79 = vector.multi_reduction <add>, %78, %cst_47 [1] : vector<4x128xf32> to vector<4xf32>
    %80 = vector.shape_cast %79 : vector<4xf32> to vector<4x1xf32>
    %81 = arith.subf %71, %80 : vector<4x1xf32>
    %82 = vector.shape_cast %81 : vector<4x1xf32> to vector<1x4x1xf32>
    %cst_48 = arith.constant dense<0.000000e+00> : vector<1xf32>
    %83 = vector.multi_reduction <add>, %82, %cst_48 [1, 2] : vector<1x4x1xf32> to vector<1xf32>
    %84 = vector.shape_cast %83 : vector<1xf32> to vector<1x1x1xf32>
    %85 = vector.extract %84[0, 0, 0] : f32 from vector<1x1x1xf32>
    %cst_49 = arith.constant 1.250000e-01 : f32
    %86 = arith.mulf %85, %cst_49 : f32
    %87 = vector.broadcast %86 : f32 to vector<1x1x1xf32>
    %c0_50 = arith.constant 0 : index
    %c0_51 = arith.constant 0 : index
    %c0_52 = arith.constant 0 : index
    %88 = vector.load %arg8[%c0_50, %c0_51, %c0_52] : memref<1x1x1xf32, #tpu.memory_space<vmem>>, vector<1x1x1xf32>
    tpu.vector_store %arg8[%c0_50, %c0_51, %c0_52], %87 {strides = array<i32>} : memref<1x1x1xf32, #tpu.memory_space<vmem>>, vector<1x1x1xf32>,
    return
  }
  func.func @transform_0(%arg0: i32) -> (i32, i32, i32, i32) {
    %c0_i32 = arith.constant 0 : i32
    %c0_i32_0 = arith.constant 0 : i32
    %c0_i32_1 = arith.constant 0 : i32
    %c0_i32_2 = arith.constant 0 : i32
    return %arg0, %c0_i32, %c0_i32_0, %c0_i32_1 : i32, i32, i32, i32
  }
  func.func @transform_1(%arg0: i32) -> (i32, i32, i32) {
    %c0_i32 = arith.constant 0 : i32
    %c0_i32_0 = arith.constant 0 : i32
    %c0_i32_1 = arith.constant 0 : i32
    return %arg0, %c0_i32, %c0_i32_0 : i32, i32, i32
  }
  func.func @transform_2(%arg0: i32) -> (i32, i32, i32) {
    %c0_i32 = arith.constant 0 : i32
    %c0_i32_0 = arith.constant 0 : i32
    %c0_i32_1 = arith.constant 0 : i32
    return %arg0, %c0_i32, %c0_i32_0 : i32, i32, i32
  }
  func.func @transform_3(%arg0: i32) -> (i32, i32, i32) {
    %c0_i32 = arith.constant 0 : i32
    %c0_i32_0 = arith.constant 0 : i32
    %c0_i32_1 = arith.constant 0 : i32
    return %arg0, %c0_i32, %c0_i32_0 : i32, i32, i32
  }
  func.func @transform_4(%arg0: i32) -> (i32, i32) {
    %c0_i32 = arith.constant 0 : i32
    %c0_i32_0 = arith.constant 0 : i32
    %c0_i32_1 = arith.constant 0 : i32
    return %c0_i32, %c0_i32_0 : i32, i32
  }
  func.func @transform_5(%arg0: i32) -> (i32, i32) {
    %c0_i32 = arith.constant 0 : i32
    %c0_i32_0 = arith.constant 0 : i32
    %c0_i32_1 = arith.constant 0 : i32
    return %c0_i32, %c0_i32_0 : i32, i32
  }
  func.func @transform_6(%arg0: i32) -> (i32, i32, i32) {
    %c0_i32 = arith.constant 0 : i32
    %c0_i32_0 = arith.constant 0 : i32
    %c0_i32_1 = arith.constant 0 : i32
    return %arg0, %c0_i32, %c0_i32_0 : i32, i32, i32
  }
  func.func @transform_7(%arg0: i32) -> (i32, i32, i32) {
    %c0_i32 = arith.constant 0 : i32
    %c0_i32_0 = arith.constant 0 : i32
    %c0_i32_1 = arith.constant 0 : i32
    return %arg0, %c0_i32, %c0_i32_0 : i32, i32, i32
  }
}

</mosaic_0001>

<bundles_post_ra>
// kernel: tpu_custom_call.1
= control target key start
LH: loop header
LB: loop body
LE: loop exit
PB: predicated region body
PF: predicated region fallthrough
CT: control target
= control target key end

     0   :  { %13 = vsyncpa [#allocation4], 0  ;;  %s2836_s0 = inlined_call_operand.vmem [shape: f32[2,8,28,1], index: 0, kind: input, shape index: {}]   ;;  %s2837_s1 = inlined_call_operand.vmem [shape: f32[2,4,128], index: 1, kind: input, shape index: {}]   ;;  %s2838_s2 = inlined_call_operand.vmem [shape: f32[2,8,128], index: 2, kind: input, shape index: {}]   ;;  %s2839_s3 = inlined_call_operand.vmem [shape: s32[2,4,1], index: 3, kind: input, shape index: {}]   ;;  %s2840_s4 = inlined_call_operand.vmem [shape: f32[3,128], index: 4, kind: input, shape index: {}]   ;;  %s2841_s5 = inlined_call_operand.vmem [shape: f32[1,128], index: 5, kind: input, shape index: {}]   ;;  %s2842_s6 = inlined_call_operand.hbm [shape: f32[2,4,128], index: 6, kind: output, shape index: {0}]   ;;  %s2843_s7 = inlined_call_operand.vmem [shape: f32[2,1,1], index: 7, kind: output, shape index: {1}]  }
   0x1   :  { %15 = vsyncpa [#allocation4 + $0x1], 0  ;;  %s2361_s24 = smov 0   ;;  %s2363_s25 = smov 0  }
   0x2   :  { %s2365_s26 = smov 0   ;;  %s2367_s27 = smov 0  }
   0x3 LB: > { %s2382_s28 = sadd.s32 4294967295, %s2313_s27   ;;  %s1988_s29 = sadd.s32 4294967294, %s2313_s27   ;;  %s2313_s27 = sphi %s2367_s27, %s2849_s27   ;;  %s2309_s26 = sphi %s2365_s26, %s2848_s26   ;;  %s2305_s25 = sphi %s2363_s25, %s2847_s25   ;;  %s2301_s24 = sphi %s2361_s24, %s2846_s24  }
   0x4   : > { %s2386_s30 = sadd.s32 1, %s2313_s27   ;;  %s174_s8 = sadd.s32 1, %s2309_s26 }
   0x5   : > { %s171_s9 = ssub.s32 %s2313_s27, %s2386_s30  ;;  %p184_p0 = scmp.ne.s32.totalorder %s2309_s26, %s2305_s25 }
   0x6   : > { %p172_p1 = scmp.eq.s32.totalorder %s171_s9, 0  ;;  %p185_p2 = scmp.eq.s32.totalorder %s2382_s28, 1 }
   0x7   : > { %p190_p3 = scmp.ne.s32.totalorder %s2305_s25, %s2301_s24  ;;  %p191_p4 = scmp.eq.s32.totalorder %s1988_s29, 1 }
   0x8   : > { %s2397_s10 = scalar_select %p172_p1, %s2309_s26, %s174_s8  }
   0x9   : > { %p2399_p5 = por %p185_p2, %p184_p0  ;;  %p2403_p6 = por %p191_p4, %p190_p3 }
   0xa   : > { %p1991_p7 = scmp.ge.s32.totalorder %s2313_s27, 1  ;;  %p270_p8 = scmp.lt.s32.totalorder %s2313_s27, 3 }
   0xc   : > { %p271_p9 = pnand %p1991_p7, %p270_p8 }
   0xd   : > { %p317_p10 = scmp.lt.s32.totalorder (!%p271_p9), %s2382_s28, 1  ;;  %s2316_s18 = smov (!%p271_p9), 1  }
   0xe   : > { %274 = sbr.rel (%p271_p9) target bundleno = 1889 (0x761), region = 44  ;;  %s2317_s19 = smov (!%p271_p9), 2  }
   0xf   : > { %s309_s23 = sand.u32 (!%p271_p9), 1, %s2305_s25  }
  0x10   : > { %s2789_s29 = sshll.u32 (!%p271_p9), %s309_s23, 2 }
  0x13   : > { %vm369_vm0 = vcmask 7168   ;;  %vm373_vm1 = vcmask 5120   ;;  %v2315_v0 = vmov 0.0   ;;  %s2477_s13 = scalar_select %p317_p10, %s2382_s28, 1  ;;  %vm406_vm2 = vcmask 3072  }
  0x14   : > { %374 = vst.msk [vmem:[#allocation2 + $0x18] sm:$0x3f] %vm373_vm1, %v2315_v0  ;;  %378 = vst.msk [vmem:[#allocation2 + $0x38] sm:$0x3f] %vm373_vm1, %v2315_v0  ;;  %vm1130_vm3 = vcmask 1042432   ;;  %vm1045_vm4 = vcmask 23552  }
  0x15   : > { %375 = vst.msk [vmem:[#allocation2 + $0x20] sm:$0xff] %vm369_vm0, %v2315_v0  ;;  %376 = vst.msk [vmem:[#allocation2 + $0x28] sm:$0xff] %vm369_vm0, %v2315_v0  ;;  %s2034_s14 = sshll.u32 %s2477_s13, 8  ;;  %vm1008_vm5 = vcmask 15360   ;;  %s1995_s22 = sshll.u32 %s2477_s13, 2  ;;  %vm1477_vm6 = vcmask 1043456  }
  0x16   : > { %370 = vst.msk [vmem:[#allocation2] sm:$0xff] %vm369_vm0, %v2315_v0  ;;  %371 = vst.msk [vmem:[#allocation2 + $0x8] sm:$0xff] %vm369_vm0, %v2315_v0  ;;  %s2483_s17 = scalar_lea.vmem %s2836_s0, %s2034_s14  ;;  %s325_s8 = scalar_lea.vmem %s2837_s1, %s1995_s22  ;;  %vm1580_vm7 = vcmask 1041409   ;;  %vm1582_vm8 = vcmask 1042434   ;;  %vm1584_vm9 = vcmask 1043459   ;;  %vm1586_vm10 = vcmask 1044484  }
  0x17   : > { %372 = vst.msk [vmem:[#allocation2 + $0x10] sm:$0xff] %vm369_vm0, %v2315_v0  ;;  %377 = vst.msk [vmem:[#allocation2 + $0x30] sm:$0xff] %vm369_vm0, %v2315_v0  ;;  %v340_v1 = vld [vmem:[%s2483_s17 + $0x18] sm:$0xf]  ;;  %v341_v2 = vld [vmem:[%s2483_s17 + $0x20] sm:$0xff]  ;;  %vm1588_vm11 = vcmask 1045509   ;;  %s333_s21 = scalar_lea.vmem %s2839_s3, %s1995_s22 }
  0x18   : > { %379 = vst.msk [vmem:[#allocation2 + $0x40] sm:$0xff] %vm369_vm0, %v2315_v0  ;;  %380 = vst.msk [vmem:[#allocation2 + $0x48] sm:$0xff] %vm369_vm0, %v2315_v0  ;;  %v337_v3 = vld [vmem:[%s2483_s17] sm:$0xff]  ;;  %v342_v4 = vld [vmem:[%s2483_s17 + $0x28] sm:$0xff]  ;;  %vm1590_vm12 = vcmask 1046534   ;;  %vm1592_vm13 = vcmask 1047559  }
  0x19   : > { %381 = vst.msk [vmem:[#allocation2 + $0x50] sm:$0xff] %vm369_vm0, %v2315_v0  ;;  %383 = vst.msk [vmem:[#allocation2 + $0x60] sm:$0xff] %vm369_vm0, %v2315_v0  ;;  %v338_v5 = vld [vmem:[%s2483_s17 + $0x8] sm:$0xff]  ;;  %v339_v6 = vld [vmem:[%s2483_s17 + $0x10] sm:$0xff]  ;;  %vm2318_vm14 = vmmov 0   ;;  %vm1724_vm15 = vcmask 60416  }
  0x1a   : > { %382 = vst.msk [vmem:[#allocation2 + $0x58] sm:$0x3f] %vm373_vm1, %v2315_v0  ;;  %386 = vst.msk [vmem:[#allocation2 + $0x78] sm:$0x3f] %vm373_vm1, %v2315_v0  ;;  %v343_v7 = vld [vmem:[%s2483_s17 + $0x30] sm:$0xff]  ;;  %v345_v9 = vld [vmem:[%s2483_s17 + $0x40] sm:$0xff] }
  0x1b   : > { %384 = vst.msk [vmem:[#allocation2 + $0x68] sm:$0xff] %vm369_vm0, %v2315_v0  ;;  %385 = vst.msk [vmem:[#allocation2 + $0x70] sm:$0xff] %vm369_vm0, %v2315_v0  ;;  %v344_v8 = vld [vmem:[%s2483_s17 + $0x38] sm:$0xf]  ;;  %v355_v10 = vld [vmem:[%s2483_s17 + $0x90] sm:$0xff]  ;;  %s1996_s15 = sshll.u32 %s2477_s13, 3 }
  0x1c   : > { %387 = vst.msk [vmem:[#allocation2 + $0x80] sm:$0xff] %vm369_vm0, %v2315_v0  ;;  %388 = vst.msk [vmem:[#allocation2 + $0x88] sm:$0xff] %vm369_vm0, %v2315_v0  ;;  %v346_v11 = vld [vmem:[%s2483_s17 + $0x48] sm:$0xff]  ;;  %v356_v12 = vld [vmem:[%s2483_s17 + $0x98] sm:$0xf]  ;;  %s311_s22 = scalar_lea.vmem [#allocation3], %s2789_s29 }
  0x1d   : > { %389 = vst.msk [vmem:[#allocation2 + $0x90] sm:$0xff] %vm369_vm0, %v2315_v0  ;;  %391 = vst.msk [vmem:[#allocation2 + $0xa0] sm:$0xff] %vm369_vm0, %v2315_v0  ;;  %v357_v13 = vld [vmem:[%s2483_s17 + $0xa0] sm:$0xff]  ;;  %v358_v14 = vld [vmem:[%s2483_s17 + $0xa8] sm:$0xff]  ;;  %s1871_s9 = sshll.u32 %s311_s22, 4  ;;  %s1872_s9 = int_to_ptr.vmem [resolvable:$true] %s1871_s9 }
  0x1e   : > { %390 = vst.msk [vmem:[#allocation2 + $0x98] sm:$0x3f] %vm373_vm1, %v2315_v0  ;;  %394 = vst.msk [vmem:[#allocation2 + $0xb8] sm:$0x3f] %vm373_vm1, %v2315_v0  ;;  %v347_v15 = vld [vmem:[%s2483_s17 + $0x50] sm:$0xff]  ;;  %v349_v19 = vld [vmem:[%s2483_s17 + $0x60] sm:$0xff] }
  0x1f   : > { %392 = vst.msk [vmem:[#allocation2 + $0xa8] sm:$0xff] %vm369_vm0, %v2315_v0  ;;  %393 = vst.msk [vmem:[#allocation2 + $0xb0] sm:$0xff] %vm369_vm0, %v2315_v0  ;;  %v348_v16 = vld [vmem:[%s2483_s17 + $0x58] sm:$0xf]  ;;  %v359_v17 = vld [vmem:[%s2483_s17 + $0xb0] sm:$0xff] }
  0x20   : > { %395 = vst.msk [vmem:[#allocation2 + $0xc0] sm:$0xff] %vm369_vm0, %v2315_v0  ;;  %396 = vst.msk [vmem:[#allocation2 + $0xc8] sm:$0xff] %vm369_vm0, %v2315_v0  ;;  %v360_v18 = vld [vmem:[%s2483_s17 + $0xb8] sm:$0xf]  ;;  %v350_v20 = vld [vmem:[%s2483_s17 + $0x68] sm:$0xff] }
  0x21   : > { %397 = vst.msk [vmem:[#allocation2 + $0xd0] sm:$0xff] %vm369_vm0, %v2315_v0  ;;  %399 = vst.msk [vmem:[#allocation2 + $0xe0] sm:$0xff] %vm369_vm0, %v2315_v0  ;;  %v351_v21 = vld [vmem:[%s2483_s17 + $0x70] sm:$0xff]  ;;  %v361_v22 = vld [vmem:[%s2483_s17 + $0xc0] sm:$0xff] }
  0x22   : > { %398 = vst.msk [vmem:[#allocation2 + $0xd8] sm:$0x3f] %vm373_vm1, %v2315_v0  ;;  %402 = vst.msk [vmem:[#allocation2 + $0xf8] sm:$0x3f] %vm373_vm1, %v2315_v0  ;;  %v362_v23 = vld [vmem:[%s2483_s17 + $0xc8] sm:$0xff]  ;;  %v363_v58 = vld [vmem:[%s2483_s17 + $0xd0] sm:$0xff] }
  0x23   : > { %400 = vst.msk [vmem:[#allocation2 + $0xe8] sm:$0xff] %vm369_vm0, %v2315_v0  ;;  %401 = vst.msk [vmem:[#allocation2 + $0xf0] sm:$0xff] %vm369_vm0, %v2315_v0  ;;  %v352_v24 = vld [vmem:[%s2483_s17 + $0x78] sm:$0xf]  ;;  %v354_v60 = vld [vmem:[%s2483_s17 + $0x88] sm:$0xff] }
  0x24   : > { %407 = vst.msk [vmem:[#allocation2 + $0x19] sm:$0xf] %vm406_vm2, %v340_v1  ;;  %411 = vst.msk [vmem:[#allocation2 + $0x39] sm:$0xf] %vm406_vm2, %v344_v8  ;;  %v364_v59 = vld [vmem:[%s2483_s17 + $0xd8] sm:$0xf] }
  0x25   : > { %408 = vst.msk [vmem:[#allocation2 + $0x21] sm:$0xff] %vm369_vm0, %v341_v2  ;;  %403 = vst.msk [vmem:[#allocation2 + $0x1] sm:$0xff] %vm369_vm0, %v337_v3  ;;  %v353_v61 = vld [vmem:[%s2483_s17 + $0x80] sm:$0xff]  ;;  %v366_v2 = vld [vmem:[%s2483_s17 + $0xe8] sm:$0xff] }
  0x26   : > { %409 = vst.msk [vmem:[#allocation2 + $0x29] sm:$0xff] %vm369_vm0, %v342_v4  ;;  %404 = vst.msk [vmem:[#allocation2 + $0x9] sm:$0xff] %vm369_vm0, %v338_v5  ;;  %v365_v1 = vld [vmem:[%s2483_s17 + $0xe0] sm:$0xff]  ;;  %v367_v3 = vld [vmem:[%s2483_s17 + $0xf0] sm:$0xff] }
  0x27   : > { %405 = vst.msk [vmem:[#allocation2 + $0x11] sm:$0xff] %vm369_vm0, %v339_v6  ;;  %410 = vst.msk [vmem:[#allocation2 + $0x31] sm:$0xff] %vm369_vm0, %v343_v7  ;;  %v368_v4 = vld [vmem:[%s2483_s17 + $0xf8] sm:$0xf]  ;;  %v1037_v7 = vld [vmem:[%s2840_s4] sm:$0x7] }
  0x28   : > { %412 = vst.msk [vmem:[#allocation2 + $0x41] sm:$0xff] %vm369_vm0, %v345_v9  ;;  %422 = vst.msk [vmem:[#allocation2 + $0x91] sm:$0xff] %vm369_vm0, %v355_v10  ;;  %2068 = vmatprep.subr.msk.mxu0 %vm1130_vm3, %v1037_v7  ;;  %2122 = vmatprep.subr.msk.mxu1 %vm1130_vm3, %v1037_v7  ;;  %s1855_s17 = scalar_lea.sflag [#allocation4], %s309_s23 }
  0x29   : > { %413 = vst.msk [vmem:[#allocation2 + $0x49] sm:$0xff] %vm369_vm0, %v346_v11  ;;  %424 = vst.msk [vmem:[#allocation2 + $0xa1] sm:$0xff] %vm369_vm0, %v357_v13  ;;  %2069 = vmatpush3.msk.msra.mxu0 %vm1130_vm3, %v1037_v7  ;;  %2123 = vmatpush3.msk.msra.mxu1 %vm1130_vm3, %v1037_v7 }
  0x2a   : > { %423 = vst.msk [vmem:[#allocation2 + $0x99] sm:$0xf] %vm406_vm2, %v356_v12  ;;  %415 = vst.msk [vmem:[#allocation2 + $0x59] sm:$0xf] %vm406_vm2, %v348_v16  ;;  %2112 = vmatprep.subr.mxu1 %v2315_v0 }
  0x2b   : > { %425 = vst.msk [vmem:[#allocation2 + $0xa9] sm:$0xff] %vm369_vm0, %v358_v14  ;;  %414 = vst.msk [vmem:[#allocation2 + $0x51] sm:$0xff] %vm369_vm0, %v347_v15  ;;  %v527_v25 = vld [vmem:[#allocation2 + $0x19] sm:$0xf] }
  0x2c   : > { %426 = vst.msk [vmem:[#allocation2 + $0xb1] sm:$0xff] %vm369_vm0, %v359_v17  ;;  %416 = vst.msk [vmem:[#allocation2 + $0x61] sm:$0xff] %vm369_vm0, %v349_v19  ;;  %v528_v26 = vld [vmem:[#allocation2 + $0x21] sm:$0xff]  ;;  %v615_v30 = vld [vmem:[#allocation2 + $0x1a] sm:$0xf] }
  0x2d   : > { %427 = vst.msk [vmem:[#allocation2 + $0xb9] sm:$0xf] %vm406_vm2, %v360_v18  ;;  %v524_v27 = vld [vmem:[#allocation2 + $0x1] sm:$0xff]  ;;  %419 = vst.msk [vmem:[#allocation2 + $0x79] sm:$0xf] %vm406_vm2, %v352_v24  ;;  %v759_v28 = vcombine.low %v527_v25, %v528_v26  ;;  %v525_v32 = vld [vmem:[#allocation2 + $0x9] sm:$0xff]  ;;  %v591_v52 = vcombine.high %v528_v26, %v528_v26 }
  0x2e   : > { %417 = vst.msk [vmem:[#allocation2 + $0x69] sm:$0xff] %vm369_vm0, %v350_v20  ;;  %418 = vst.msk [vmem:[#allocation2 + $0x71] sm:$0xff] %vm369_vm0, %v351_v21  ;;  %v588_v29 = vcombine.high %v524_v27, %v524_v27  ;;  %v616_v31 = vld [vmem:[#allocation2 + $0x22] sm:$0xff]  ;;  %v589_v33 = vcombine.high %v525_v32, %v525_v32  ;;  %v526_v35 = vld [vmem:[#allocation2 + $0x11] sm:$0xff] }
  0x2f   : > { %428 = vst.msk [vmem:[#allocation2 + $0xc1] sm:$0xff] %vm369_vm0, %v361_v22  ;;  %429 = vst.msk [vmem:[#allocation2 + $0xc9] sm:$0xff] %vm369_vm0, %v362_v23  ;;  %v612_v34 = vld [vmem:[#allocation2 + $0x2] sm:$0xff]  ;;  %790 = vrot.lane.b32.xlu1 %v759_v28, %s2316_s18  ;;  %v871_v37 = vcombine.low %v615_v30, %v616_v31  ;;  %v613_v39 = vld [vmem:[#allocation2 + $0xa] sm:$0xff]  ;;  %v590_v41 = vcombine.high %v526_v35, %v526_v35  ;;  %v679_v63 = vcombine.high %v616_v31, %v616_v31 }
  0x30   : > { %v756_v36 = vcombine.low %v524_v27, %v588_v29  ;;  %v676_v38 = vcombine.high %v612_v34, %v612_v34  ;;  %v757_v40 = vcombine.low %v525_v32, %v589_v33  ;;  %v614_v42 = vld [vmem:[#allocation2 + $0x12] sm:$0xff]  ;;  %v677_v44 = vcombine.high %v613_v39, %v613_v39  ;;  %v529_v45 = vld [vmem:[#allocation2 + $0x29] sm:$0xff]  ;;  %v532_v57 = vld [vmem:[#allocation2 + $0x41] sm:$0xff]  ;;  %430 = vst.msk [vmem:[#allocation2 + $0xd1] sm:$0xff] %vm369_vm0, %v363_v58 }
  0x31   : > { %v758_v46 = vcombine.low %v526_v35, %v590_v41  ;;  %v678_v47 = vcombine.high %v614_v42, %v614_v42  ;;  %v592_v49 = vcombine.high %v529_v45, %v529_v45  ;;  %v530_v50 = vld [vmem:[#allocation2 + $0x31] sm:$0xff]  ;;  %v760_v62 = vcombine.low %v591_v52, %v529_v45  ;;  %431 = vst.msk [vmem:[#allocation2 + $0xd9] sm:$0xf] %vm406_vm2, %v364_v59  ;;  %v531_v10 = vld [vmem:[#allocation2 + $0x39] sm:$0xf]  ;;  %v620_v15 = vld [vmem:[#allocation2 + $0x42] sm:$0xff] }
  0x32   : > { %784 = vrot.lane.b32.xlu0 %v756_v36, %s2316_s18  ;;  %v868_v43 = vcombine.low %v612_v34, %v676_v38  ;;  %v869_v48 = vcombine.low %v613_v39, %v677_v44  ;;  %v617_v51 = vld [vmem:[#allocation2 + $0x2a] sm:$0xff]  ;;  %v618_v55 = vld [vmem:[#allocation2 + $0x32] sm:$0xff]  ;;  %421 = vst.msk [vmem:[#allocation2 + $0x89] sm:$0xff] %vm369_vm0, %v354_v60  ;;  %420 = vst.msk [vmem:[#allocation2 + $0x81] sm:$0xff] %vm369_vm0, %v353_v61  ;;  %v594_v6 = vcombine.high %v532_v57, %v532_v57 }
  0x33   : > { %902 = vrot.lane.b32.xlu1 %v871_v37, %s2317_s19  ;;  %v870_v53 = vcombine.low %v614_v42, %v678_v47  ;;  %v761_v54 = vcombine.low %v592_v49, %v530_v50  ;;  %v680_v56 = vcombine.high %v617_v51, %v617_v51  ;;  %432 = vst.msk [vmem:[#allocation2 + $0xe1] sm:$0xff] %vm369_vm0, %v365_v1  ;;  %433 = vst.msk [vmem:[#allocation2 + $0xe9] sm:$0xff] %vm369_vm0, %v366_v2  ;;  %v542_v11 = vld [vmem:[#allocation2 + $0x91] sm:$0xff]  ;;  %v619_v14 = vld [vmem:[#allocation2 + $0x3a] sm:$0xf] }
  0x34   : > { %434 = vst.msk [vmem:[#allocation2 + $0xf1] sm:$0xff] %vm369_vm0, %v367_v3  ;;  %v872_v8 = vcombine.low %v679_v63, %v617_v51  ;;  %v593_v9 = vcombine.high %v530_v50, %v530_v50  ;;  %v763_v12 = vcombine.low %v532_v57, %v594_v6  ;;  %v681_v13 = vcombine.high %v618_v55, %v618_v55  ;;  %v543_v21 = vld [vmem:[#allocation2 + $0x99] sm:$0xf]  ;;  %v544_v22 = vld [vmem:[#allocation2 + $0xa1] sm:$0xff]  ;;  %v534_v27 = vld [vmem:[#allocation2 + $0x51] sm:$0xff] }
  0x35   : > { %v873_v5 = vcombine.low %v680_v56, %v618_v55  ;;  %435 = vst.msk [vmem:[#allocation2 + $0xf9] sm:$0xf] %vm406_vm2, %v368_v4  ;;  %v602_v17 = vcombine.high %v542_v11, %v542_v11  ;;  %v682_v19 = vcombine.high %v620_v15, %v620_v15  ;;  %v630_v23 = vld [vmem:[#allocation2 + $0x92] sm:$0xff]  ;;  %v631_v25 = vld [vmem:[#allocation2 + $0x9a] sm:$0xf]  ;;  %v632_v26 = vld [vmem:[#allocation2 + $0xa2] sm:$0xff]  ;;  %v773_v28 = vcombine.low %v543_v21, %v544_v22 }
  0x36   : > { %786 = vrot.lane.b32.xlu0 %v757_v40, %s2316_s18  ;;  %v762_v16 = vcombine.low %v593_v9, %v531_v10  ;;  %v874_v18 = vcombine.low %v681_v13, %v619_v14  ;;  %v690_v29 = vcombine.high %v630_v23, %v630_v23  ;;  %v533_v30 = vld [vmem:[#allocation2 + $0x49] sm:$0xff]  ;;  %v885_v31 = vcombine.low %v631_v25, %v632_v26  ;;  %v622_v38 = vld [vmem:[#allocation2 + $0x52] sm:$0xff]  ;;  %v536_v51 = vld [vmem:[#allocation2 + $0x61] sm:$0xff] }
  0x37   : > { %896 = vrot.lane.b32.xlu1 %v868_v43, %s2317_s19  ;;  %v772_v20 = vcombine.low %v542_v11, %v602_v17  ;;  %v875_v24 = vcombine.low %v620_v15, %v682_v19  ;;  %v596_v32 = vcombine.high %v534_v27, %v534_v27  ;;  %v621_v33 = vld [vmem:[#allocation2 + $0x4a] sm:$0xff]  ;;  %v595_v35 = vcombine.high %v533_v30, %v533_v30  ;;  %v634_v50 = vld [vmem:[#allocation2 + $0xb2] sm:$0xff]  ;;  %v623_v60 = vld [vmem:[#allocation2 + $0x5a] sm:$0xf] }
  0x38   : > { %v884_v34 = vcombine.low %v630_v23, %v690_v29  ;;  %v683_v37 = vcombine.high %v621_v33, %v621_v33  ;;  %v603_v40 = vcombine.high %v544_v22, %v544_v22  ;;  %v545_v41 = vld [vmem:[#allocation2 + $0xa9] sm:$0xff]  ;;  %v684_v43 = vcombine.high %v622_v38, %v622_v38  ;;  %v546_v47 = vld [vmem:[#allocation2 + $0xb1] sm:$0xff]  ;;  %v535_v58 = vld [vmem:[#allocation2 + $0x59] sm:$0xf] }
  0x39   : > { %v765_v36 = vcombine.low %v534_v27, %v596_v32  ;;  %v764_v39 = vcombine.low %v533_v30, %v595_v35  ;;  %v633_v44 = vld [vmem:[#allocation2 + $0xaa] sm:$0xff]  ;;  %v597_v55 = vcombine.high %v536_v51, %v536_v51  ;;  %v624_v61 = vld [vmem:[#allocation2 + $0x62] sm:$0xff]  ;;  %v605_v63 = vcombine.high %v546_v47, %v546_v47  ;;  %v547_v1 = vld [vmem:[#allocation2 + $0xb9] sm:$0xf] }
  0x3a   : > { %788 = vrot.lane.b32.xlu0 %v758_v46, %s2316_s18  ;;  %v876_v42 = vcombine.low %v621_v33, %v683_v37  ;;  %v774_v45 = vcombine.low %v603_v40, %v545_v41  ;;  %v604_v46 = vcombine.high %v545_v41, %v545_v41  ;;  %v692_v49 = vcombine.high %v633_v44, %v633_v44  ;;  %v537_v56 = vld [vmem:[#allocation2 + $0x69] sm:$0xff]  ;;  %v548_v2 = vld [vmem:[#allocation2 + $0xc1] sm:$0xff]  ;;  %v538_v11 = vld [vmem:[#allocation2 + $0x71] sm:$0xff] }
  0x3b   : > { %898 = vrot.lane.b32.xlu1 %v869_v48, %s2317_s19  ;;  %v877_v48 = vcombine.low %v622_v38, %v684_v43  ;;  %v767_v59 = vcombine.low %v597_v55, %v537_v56  ;;  %v878_v3 = vcombine.low %v623_v60, %v624_v61  ;;  %v685_v4 = vcombine.high %v624_v61, %v624_v61  ;;  %v636_v6 = vld [vmem:[#allocation2 + $0xc2] sm:$0xff]  ;;  %v635_v14 = vld [vmem:[#allocation2 + $0xba] sm:$0xf]  ;;  %v626_v23 = vld [vmem:[#allocation2 + $0x72] sm:$0xff] }
  0x3c   : > { %v775_v52 = vcombine.low %v604_v46, %v546_v47  ;;  %v776_v7 = vcombine.low %v605_v63, %v547_v1  ;;  %v694_v10 = vcombine.high %v636_v6, %v636_v6  ;;  %v693_v13 = vcombine.high %v634_v50, %v634_v50  ;;  %v539_v17 = vld [vmem:[#allocation2 + $0x79] sm:$0xf]  ;;  %v637_v33 = vld [vmem:[#allocation2 + $0xca] sm:$0xff] }
  0x3d   : > { %v598_v19 = vcombine.high %v537_v56, %v537_v56  ;;  %v627_v29 = vld [vmem:[#allocation2 + $0x7a] sm:$0xf]  ;;  %v638_v30 = vld [vmem:[#allocation2 + $0xd2] sm:$0xff]  ;;  %v695_v38 = vcombine.high %v637_v33, %v637_v33  ;;  %v629_v47 = vld [vmem:[#allocation2 + $0x8a] sm:$0xff] }
  0x3e   : > { %900 = vrot.lane.b32.xlu0 %v870_v53, %s2317_s19  ;;  %v691_v53 = vcombine.high %v632_v26, %v632_v26  ;;  %v889_v15 = vcombine.low %v636_v6, %v694_v10  ;;  %v550_v26 = vld [vmem:[#allocation2 + $0xd1] sm:$0xff]  ;;  %v696_v35 = vcombine.high %v638_v30, %v638_v30  ;;  %v553_v56 = vld [vmem:[#allocation2 + $0xe9] sm:$0xff] }
  0x3f   : > { %794 = vrot.lane.b32.xlu1 %v761_v54, %s2316_s18  ;;  %v887_v54 = vcombine.low %v692_v49, %v634_v50  ;;  %v608_v32 = vcombine.high %v550_v26, %v550_v26  ;;  %v890_v43 = vcombine.low %v637_v33, %v695_v38  ;;  %v551_v49 = vld [vmem:[#allocation2 + $0xd9] sm:$0xf]  ;;  %v552_v50 = vld [vmem:[#allocation2 + $0xe1] sm:$0xff]  ;;  %v554_v60 = vld [vmem:[#allocation2 + $0xf1] sm:$0xff] }
  0x40   : > { %v886_v57 = vcombine.low %v691_v53, %v633_v44  ;;  %v891_v40 = vcombine.low %v638_v30, %v696_v35  ;;  %v640_v53 = vld [vmem:[#allocation2 + $0xe2] sm:$0xff]  ;;  %v609_v55 = vcombine.high %v552_v50, %v552_v50  ;;  %v611_v1 = vcombine.high %v554_v60, %v554_v60 }
  0x41   : > { %v779_v37 = vcombine.low %v550_v26, %v608_v32  ;;  %v441_v33 = vld [vmem:[#allocation2 + $0x28] sm:$0xff] }
  0x42   : > { %792 = vrot.lane.b32.xlu0 %v760_v62, %s2316_s18  ;;  %v766_v62 = vcombine.low %v535_v58, %v536_v51  ;;  %v697_v58 = vcombine.high %v640_v53, %v640_v53  ;;  %v781_v61 = vcombine.low %v609_v55, %v553_v56 }
  0x43   : > { %906 = vrot.lane.b32.xlu1 %v873_v5, %s2317_s19  ;;  %v625_v5 = vld [vmem:[#allocation2 + $0x6a] sm:$0xff] }
  0x44   : > { %v879_v9 = vcombine.low %v685_v4, %v625_v5  ;;  %v686_v22 = vcombine.high %v625_v5, %v625_v5  ;;  %v610_v5 = vcombine.high %v553_v56, %v553_v56 }
  0x46   : > { %904 = vrot.lane.b32.xlu0 %v872_v8, %s2317_s19  ;;  %v606_v8 = vcombine.high %v548_v2, %v548_v2  ;;  %v880_v27 = vcombine.low %v686_v22, %v626_v23 }
  0x47   : > { %798 = vrot.lane.b32.xlu1 %v763_v12, %s2316_s18 }
  0x48   : > { %v777_v12 = vcombine.low %v548_v2, %v606_v8  ;;  %v555_v2 = vld [vmem:[#allocation2 + $0xf9] sm:$0xf] }
  0x49   : > { %v783_v6 = vcombine.low %v611_v1, %v555_v2  ;;  %v643_v8 = vld [vmem:[#allocation2 + $0xfa] sm:$0xf] }
  0x4a   : > { %796 = vrot.lane.b32.xlu0 %v762_v16, %s2316_s18  ;;  %v599_v16 = vcombine.high %v538_v11, %v538_v11 }
  0x4b   : > { %908 = vrot.lane.b32.xlu1 %v874_v18, %s2317_s19  ;;  %v888_v18 = vcombine.low %v693_v13, %v635_v14  ;;  %v436_v13 = vld [vmem:[#allocation2] sm:$0xff] }
  0x4c   : > { %v769_v21 = vcombine.low %v599_v16, %v539_v17  ;;  %v437_v16 = vld [vmem:[#allocation2 + $0x8] sm:$0xff] }
  0x4e   : > { %816 = vrot.lane.b32.xlu0 %v772_v20, %s2316_s18  ;;  %v549_v20 = vld [vmem:[#allocation2 + $0xc9] sm:$0xff] }
  0x4f   : > { %910 = vrot.lane.b32.xlu1 %v875_v24, %s2317_s19  ;;  %v768_v24 = vcombine.low %v598_v19, %v538_v11  ;;  %v607_v25 = vcombine.high %v549_v20, %v549_v20 }
  0x52   : > { %818 = vrot.lane.b32.xlu0 %v773_v28, %s2316_s18  ;;  %v687_v28 = vcombine.high %v626_v23, %v626_v23 }
  0x53   : > { %930 = vrot.lane.b32.xlu1 %v885_v31, %s2317_s19  ;;  %v778_v31 = vcombine.low %v549_v20, %v607_v25  ;;  %v439_v25 = vld [vmem:[#allocation2 + $0x18] sm:$0xf] }
  0x56   : > { %928 = vrot.lane.b32.xlu0 %v884_v34, %s2317_s19  ;;  %v881_v34 = vcombine.low %v687_v28, %v627_v29 }
  0x57   : > { %802 = vrot.lane.b32.xlu1 %v765_v36, %s2316_s18  ;;  %v541_v36 = vld [vmem:[#allocation2 + $0x89] sm:$0xff] }
  0x58   : > { %v601_v41 = vcombine.high %v541_v36, %v541_v36 }
  0x5a   : > { %800 = vrot.lane.b32.xlu0 %v764_v39, %s2316_s18  ;;  %v540_v39 = vld [vmem:[#allocation2 + $0x81] sm:$0xff] }
  0x5b   : > { %912 = vrot.lane.b32.xlu1 %v876_v42, %s2317_s19  ;;  %v628_v42 = vld [vmem:[#allocation2 + $0x82] sm:$0xff]  ;;  %v600_v44 = vcombine.high %v540_v39, %v540_v39 }
  0x5c   : > { %v688_v46 = vcombine.high %v628_v42, %v628_v42 }
  0x5e   : > { %820 = vrot.lane.b32.xlu0 %v774_v45, %s2316_s18  ;;  %v771_v45 = vcombine.low %v541_v36, %v601_v41  ;;  %v882_v51 = vcombine.low %v628_v42, %v688_v46  ;;  %v442_v41 = vld [vmem:[#allocation2 + $0x30] sm:$0xff] }
  0x5f   : > { %914 = vrot.lane.b32.xlu1 %v877_v48, %s2317_s19  ;;  %v770_v48 = vcombine.low %v540_v39, %v600_v44 }
  0x62   : > { %822 = vrot.lane.b32.xlu0 %v775_v52, %s2316_s18  ;;  %v689_v52 = vcombine.high %v629_v47, %v629_v47 }
  0x63   : > { %934 = vrot.lane.b32.xlu1 %v887_v54, %s2317_s19  ;;  %v780_v54 = vcombine.low %v551_v49, %v552_v50  ;;  %v505_v49 = vcombine.high %v442_v41, %v442_v41 }
  0x66   : > { %932 = vrot.lane.b32.xlu0 %v886_v57, %s2317_s19  ;;  %v883_v57 = vcombine.low %v629_v47, %v689_v52 }
  0x67   : > { %806 = vrot.lane.b32.xlu1 %v767_v59, %s2316_s18  ;;  %v641_v59 = vld [vmem:[#allocation2 + $0xea] sm:$0xff] }
  0x68   : > { %v893_v63 = vcombine.low %v697_v58, %v641_v59  ;;  %v698_v10 = vcombine.high %v641_v59, %v641_v59 }
  0x6a   : > { %804 = vrot.lane.b32.xlu0 %v766_v62, %s2316_s18  ;;  %v639_v62 = vld [vmem:[#allocation2 + $0xda] sm:$0xf] }
  0x6b   : > { %916 = vrot.lane.b32.xlu1 %v878_v3, %s2317_s19  ;;  %v642_v3 = vld [vmem:[#allocation2 + $0xf2] sm:$0xff]  ;;  %v892_v4 = vcombine.low %v639_v62, %v640_v53  ;;  %v444_v53 = vld [vmem:[#allocation2 + $0x40] sm:$0xff] }
  0x6c   : > { %v506_v59 = vcombine.high %v444_v53, %v444_v53 }
  0x6e   : > { %824 = vrot.lane.b32.xlu0 %v776_v7, %s2316_s18  ;;  %v699_v7 = vcombine.high %v642_v3, %v642_v3  ;;  %v707_v1 = vcombine.low %v444_v53, %v506_v59  ;;  %v449_v53 = vld [vmem:[#allocation2 + $0x68] sm:$0xff] }
  0x6f   : > { %918 = vrot.lane.b32.xlu1 %v879_v9, %s2317_s19  ;;  %v782_v9 = vcombine.low %v610_v5, %v554_v60 }
  0x70   : > { %v895_v11 = vcombine.low %v699_v7, %v643_v8  ;;  %v456_v7 = vld [vmem:[#allocation2 + $0xa0] sm:$0xff] }
  0x72   : > { %826 = vrot.lane.b32.xlu0 %v777_v12, %s2316_s18  ;;  %v894_v12 = vcombine.low %v698_v10, %v642_v3  ;;  %v445_v10 = vld [vmem:[#allocation2 + $0x48] sm:$0xff] }
  0x73   : > { %938 = vrot.lane.b32.xlu1 %v889_v15, %s2317_s19  ;;  %v500_v15 = vcombine.high %v436_v13, %v436_v13 }
  0x75   : > { %v700_v19 = vcombine.low %v436_v13, %v500_v15  ;;  %v507_v15 = vcombine.high %v445_v10, %v445_v10 }
  0x76   : > { %936 = vrot.lane.b32.xlu0 %v888_v18, %s2317_s19  ;;  %v438_v18 = vld [vmem:[#allocation2 + $0x10] sm:$0xff] }
  0x77   : > { %810 = vrot.lane.b32.xlu1 %v769_v21, %s2316_s18  ;;  %v501_v21 = vcombine.high %v437_v16, %v437_v16  ;;  %v502_v23 = vcombine.high %v438_v18, %v438_v18 }
  0x7a   : > { %808 = vrot.lane.b32.xlu0 %v768_v24, %s2316_s18  ;;  %v440_v24 = vld [vmem:[#allocation2 + $0x20] sm:$0xff] }
  0x7b   : > { %920 = vrot.lane.b32.xlu1 %v880_v27, %s2317_s19  ;;  %v701_v27 = vcombine.low %v437_v16, %v501_v21  ;;  %v703_v30 = vcombine.low %v439_v25, %v440_v24  ;;  %v503_v42 = vcombine.high %v440_v24, %v440_v24 }
  0x7d   : > { %v704_v47 = vcombine.low %v503_v42, %v441_v33 }
  0x7e   : > { %828 = vrot.lane.b32.xlu0 %v778_v31, %s2316_s18  ;;  %v702_v31 = vcombine.low %v438_v18, %v502_v23  ;;  %v446_v18 = vld [vmem:[#allocation2 + $0x50] sm:$0xff] }
  0x7f   : > { %922 = vrot.lane.b32.xlu1 %v881_v34, %s2317_s19  ;;  %v508_v24 = vcombine.high %v446_v18, %v446_v18 }
  0x82   : > { %830 = vrot.lane.b32.xlu0 %v779_v37, %s2316_s18  ;;  %v504_v37 = vcombine.high %v441_v33, %v441_v33  ;;  %v515_v33 = vcombine.high %v456_v7, %v456_v7 }
  0x83   : > { %942 = vrot.lane.b32.xlu1 %v891_v40, %s2317_s19 }
  0x84   : > { %v705_v46 = vcombine.low %v504_v37, %v442_v41 }
  0x86   : > { %940 = vrot.lane.b32.xlu0 %v890_v43, %s2317_s19 }
  0x87   : > { %814 = vrot.lane.b32.xlu1 %v771_v45, %s2316_s18 }
  0x8a   : > { %812 = vrot.lane.b32.xlu0 %v770_v48, %s2316_s18 }
  0x8b   : > { %924 = vrot.lane.b32.xlu1 %v882_v51, %s2317_s19  ;;  %v443_v51 = vld [vmem:[#allocation2 + $0x38] sm:$0xf] }
  0x8e   : > { %832 = vrot.lane.b32.xlu0 %v780_v54, %s2316_s18 }
  0x8f   : > { %926 = vrot.lane.b32.xlu1 %v883_v57, %s2317_s19  ;;  %v706_v57 = vcombine.low %v505_v49, %v443_v51 }
  0x92   : > { %834 = vrot.lane.b32.xlu0 %v781_v61, %s2316_s18 }
  0x93   : > { %946 = vrot.lane.b32.xlu1 %v893_v63, %s2317_s19  ;;  %v454_v63 = vld [vmem:[#allocation2 + $0x90] sm:$0xff] }
  0x96   : > { %944 = vrot.lane.b32.xlu0 %v892_v4, %s2317_s19  ;;  %v514_v4 = vcombine.high %v454_v63, %v454_v63 }
  0x97   : > { %838 = vrot.lane.b32.xlu1 %v783_v6, %s2316_s18  ;;  %v455_v6 = vld [vmem:[#allocation2 + $0x98] sm:$0xf] }
  0x98   : > { %v716_v13 = vcombine.low %v454_v63, %v514_v4  ;;  %v459_v63 = vld [vmem:[#allocation2 + $0xb8] sm:$0xf] }
  0x9a   : > { %836 = vrot.lane.b32.xlu0 %v782_v9, %s2316_s18  ;;  %s329_s18 = scalar_lea.vmem %s2838_s2, %s1996_s15 }
  0x9b   : > { %950 = vrot.lane.b32.xlu1 %v895_v11, %s2317_s19 }
  0x9e   : > { %948 = vrot.lane.b32.xlu0 %v894_v12, %s2317_s19  ;;  %v717_v12 = vcombine.low %v455_v6, %v456_v7  ;;  %v510_v7 = vcombine.high %v449_v53, %v449_v53  ;;  %s2320_s19 = smov [#allocation3]  }
  0x9f   : > { %s2257_s20 = sshll.u32 %s2320_s19, 4  ;;  %s2258_s20 = int_to_ptr.vmem [resolvable:$false] %s2257_s20 }
  0xa0   : > { %p2260_p0 = scmp.lt.s32.totalorder %s1872_s9, %s2258_s20 }
  0xa1   : > { %v791_v14 = vpop.permute.xlu1 %790 }
  0xa2   : > { %v983_v38 = vsel %vm369_vm0, %v703_v30, %v791_v14  ;;  %v457_v30 = vld [vmem:[#allocation2 + $0xa8] sm:$0xff] }
  0xa4   : > { %v785_v17 = vpop.permute.xlu0 %784 }
  0xa5   : > { %v903_v20 = vpop.permute.xlu1 %902  ;;  %v980_v26 = vsel %vm369_vm0, %v700_v19, %v785_v17 }
  0xa6   : > { %v1012_v45 = vsel %vm1008_vm5, %v983_v38, %v903_v20 }
  0xa8   : > { %v787_v22 = vpop.permute.xlu0 %786 }
  0xa9   : > { %v897_v28 = vpop.permute.xlu1 %896  ;;  %v981_v34 = vsel %vm369_vm0, %v701_v27, %v787_v22  ;;  %v708_v22 = vcombine.low %v445_v10, %v507_v15 }
  0xaa   : > { %v1009_v29 = vsel %vm1008_vm5, %v980_v26, %v897_v28  ;;  %v709_v28 = vcombine.low %v446_v18, %v508_v24  ;;  %v451_v18 = vld [vmem:[#allocation2 + $0x78] sm:$0xf] }
  0xab   : > { %2070 = vmatprep.mubr.msk.f32.mxu0 %vm1045_vm4, %v1009_v29 }
  0xac   : > { %v789_v32 = vpop.permute.xlu0 %788 }
  0xad   : > { %v899_v35 = vpop.permute.xlu1 %898  ;;  %v982_v39 = vsel %vm369_vm0, %v702_v31, %v789_v32  ;;  %v516_v32 = vcombine.high %v457_v30, %v457_v30 }
  0xae   : > { %v1010_v36 = vsel %vm1008_vm5, %v981_v34, %v899_v35  ;;  %v458_v35 = vld [vmem:[#allocation2 + $0xb0] sm:$0xff] }
  0xaf   : > { %2071 = vmatmul.mubr.msk.f32.vlgmr.msra.gmra.mxu0 %vm1045_vm4, %v1010_v36 }
  0xb0   : > { %v901_v40 = vpop.permute.xlu0 %900 }
  0xb1   : > { %v1011_v43 = vsel %vm1008_vm5, %v982_v39, %v901_v40  ;;  %v795_v44 = vpop.permute.xlu1 %794  ;;  %v719_v39 = vcombine.low %v516_v32, %v458_v35  ;;  %v718_v40 = vcombine.low %v515_v33, %v457_v30 }
  0xb2   : > { %2073 = vmatprep.mubr.msk.f32.mxu0 %vm1045_vm4, %v1011_v43  ;;  %v985_v52 = vsel %vm369_vm0, %v705_v46, %v795_v44  ;;  %v448_v43 = vld [vmem:[#allocation2 + $0x60] sm:$0xff]  ;;  %v447_v44 = vld [vmem:[#allocation2 + $0x58] sm:$0xf] }
  0xb3   : > { %2074 = vmatmul.mubr.msk.f32.gmra.mxu0 %vm1045_vm4, %v1012_v45  ;;  %v710_v49 = vcombine.low %v447_v44, %v448_v43  ;;  %v509_v51 = vcombine.high %v448_v43, %v448_v43 }
  0xb4   : > { %v793_v48 = vpop.permute.xlu0 %792 }
  0xb5   : > { %v907_v50 = vpop.permute.xlu1 %906  ;;  %v984_v54 = vsel %vm369_vm0, %v704_v47, %v793_v48 }
  0xb6   : > { %v1014_v58 = vsel %vm1008_vm5, %v985_v52, %v907_v50 }
  0xb8   : > { %v905_v55 = vpop.permute.xlu0 %904 }
  0xb9   : > { %v1013_v56 = vsel %vm1008_vm5, %v984_v54, %v905_v55  ;;  %v799_v60 = vpop.permute.xlu1 %798  ;;  %v460_v55 = vld [vmem:[#allocation2 + $0xc0] sm:$0xff] }
  0xba   : > { %2076 = vmatprep.mubr.msk.f32.mxu0 %vm1045_vm4, %v1013_v56  ;;  %v987_v8 = vsel %vm369_vm0, %v707_v1, %v799_v60  ;;  %v518_v60 = vcombine.high %v460_v55, %v460_v55 }
  0xbb   : > { %2077 = vmatmul.mubr.msk.f32.gmra.mxu0 %vm1045_vm4, %v1014_v58 }
  0xbc   : > { %v797_v61 = vpop.permute.xlu0 %796  ;;  %v721_v4 = vcombine.low %v460_v55, %v518_v60  ;;  %v465_v55 = vld [vmem:[#allocation2 + $0xe8] sm:$0xff] }
  0xbd   : > { %v986_v62 = vsel %vm369_vm0, %v706_v57, %v797_v61  ;;  %v909_v2 = vpop.permute.xlu1 %908  ;;  %v711_v57 = vcombine.low %v509_v51, %v449_v53  ;;  %v517_v61 = vcombine.high %v458_v35, %v458_v35  ;;  %v464_v51 = vld [vmem:[#allocation2 + $0xe0] sm:$0xff] }
  0xbe   : > { %v1015_v3 = vsel %vm1008_vm5, %v986_v62, %v909_v2  ;;  %v521_v53 = vcombine.high %v464_v51, %v464_v51 }
  0xbf   : > { %2079 = vmatprep.mubr.msk.f32.mxu0 %vm1045_vm4, %v1015_v3 }
  0xc0   : > { %v817_v5 = vpop.permute.xlu0 %816  ;;  %v725_v60 = vcombine.low %v521_v53, %v465_v55 }
  0xc1   : > { %v911_v9 = vpop.permute.xlu1 %910  ;;  %v996_v19 = vsel %vm369_vm0, %v716_v13, %v817_v5  ;;  %v720_v5 = vcombine.low %v517_v61, %v459_v63  ;;  %v466_v63 = vld [vmem:[#allocation2 + $0xf0] sm:$0xff] }
  0xc2   : > { %v1016_v11 = vsel %vm1008_vm5, %v987_v8, %v911_v9  ;;  %v450_v9 = vld [vmem:[#allocation2 + $0x70] sm:$0xff] }
  0xc3   : > { %2080 = vmatmul.mubr.msk.f32.gmra.mxu0 %vm1045_vm4, %v1016_v11 }
  0xc4   : > { %v819_v14 = vpop.permute.xlu0 %818 }
  0xc5   : > { %v931_v16 = vpop.permute.xlu1 %930  ;;  %v997_v17 = vsel %vm369_vm0, %v717_v12, %v819_v14  ;;  %v712_v14 = vcombine.low %v510_v7, %v450_v9  ;;  %v522_v7 = vcombine.high %v465_v55, %v465_v55 }
  0xc6   : > { %v1026_v23 = vsel %vm1008_vm5, %v997_v17, %v931_v16  ;;  %v511_v16 = vcombine.high %v450_v9, %v450_v9 }
  0xc8   : > { %v929_v20 = vpop.permute.xlu0 %928 }
  0xc9   : > { %v1025_v21 = vsel %vm1008_vm5, %v996_v19, %v929_v20  ;;  %v803_v25 = vpop.permute.xlu1 %802  ;;  %v462_v20 = vld [vmem:[#allocation2 + $0xd0] sm:$0xff] }
  0xca   : > { %2094 = vmatprep.mubr.msk.f32.mxu1 %vm1045_vm4, %v1025_v21  ;;  %v989_v36 = vsel %vm369_vm0, %v709_v28, %v803_v25 }
  0xcb   : > { %2095 = vmatmul.mubr.msk.f32.vlgmr.msra.gmra.mxu1 %vm1045_vm4, %v1026_v23  ;;  %v713_v23 = vcombine.low %v511_v16, %v451_v18 }
  0xcc   : > { %v801_v26 = vpop.permute.xlu0 %800 }
  0xcd   : > { %v988_v27 = vsel %vm369_vm0, %v708_v22, %v801_v26  ;;  %v913_v29 = vpop.permute.xlu1 %912  ;;  %v461_v22 = vld [vmem:[#allocation2 + $0xc8] sm:$0xff]  ;;  %v520_v26 = vcombine.high %v462_v20, %v462_v20 }
  0xce   : > { %v1017_v31 = vsel %vm1008_vm5, %v988_v27, %v913_v29  ;;  %v519_v27 = vcombine.high %v461_v22, %v461_v22 }
  0xcf   : > { %2082 = vmatprep.mubr.msk.f32.mxu0 %vm1045_vm4, %v1017_v31  ;;  %v452_v31 = vld [vmem:[#allocation2 + $0x80] sm:$0xff]  ;;  %v723_v33 = vcombine.low %v462_v20, %v520_v26 }
  0xd0   : > { %v821_v34 = vpop.permute.xlu0 %820  ;;  %v2703_v20 = vld [vmem:[%s325_s8] sm:$0xf]  ;;  %s2031_s8 = sshll.u32 %s2382_s28, 6 }
  0xd1   : > { %v915_v37 = vpop.permute.xlu1 %914  ;;  %v998_v46 = vsel %vm369_vm0, %v718_v40, %v821_v34  ;;  %v722_v34 = vcombine.low %v461_v22, %v519_v27  ;;  %s1869_s16 = scalar_lea.hbm %s2842_s6, %s2031_s8 }
  0xd2   : > { %v1018_v38 = vsel %vm1008_vm5, %v989_v36, %v915_v37  ;;  %v512_v36 = vcombine.high %v452_v31, %v452_v31 }
  0xd3   : > { %2083 = vmatmul.mubr.msk.f32.gmra.mxu0 %vm1045_vm4, %v1018_v38 }
  0xd4   : > { %v823_v41 = vpop.permute.xlu0 %822  ;;  %v714_v43 = vcombine.low %v452_v31, %v512_v36 }
  0xd5   : > { %v935_v42 = vpop.permute.xlu1 %934  ;;  %v999_v45 = vsel %vm369_vm0, %v719_v39, %v823_v41  ;;  %v453_v39 = vld [vmem:[#allocation2 + $0x88] sm:$0xff] }
  0xd6   : > { %v1028_v50 = vsel %vm1008_vm5, %v999_v45, %v935_v42  ;;  %v513_v45 = vcombine.high %v453_v39, %v453_v39 }
  0xd8   : > { %v933_v47 = vpop.permute.xlu0 %932 }
  0xd9   : > { %v1027_v48 = vsel %vm1008_vm5, %v998_v46, %v933_v47  ;;  %v807_v52 = vpop.permute.xlu1 %806 }
  0xda   : > { %2097 = vmatprep.mubr.msk.f32.mxu1 %vm1045_vm4, %v1027_v48  ;;  %v991_v1 = vsel %vm369_vm0, %v711_v57, %v807_v52 }
  0xdb   : > { %2098 = vmatmul.mubr.msk.f32.gmra.mxu1 %vm1045_vm4, %v1028_v50 }
  0xdc   : > { %v805_v54 = vpop.permute.xlu0 %804 }
  0xdd   : > { %v990_v56 = vsel %vm369_vm0, %v710_v49, %v805_v54  ;;  %v917_v58 = vpop.permute.xlu1 %916  ;;  %v715_v49 = vcombine.low %v453_v39, %v513_v45 }
  0xde   : > { %v1019_v59 = vsel %vm1008_vm5, %v990_v56, %v917_v58  ;;  %v463_v56 = vld [vmem:[#allocation2 + $0xd8] sm:$0xf] }
  0xdf   : > { %2085 = vmatprep.mubr.msk.f32.mxu0 %vm1045_vm4, %v1019_v59  ;;  %v724_v61 = vcombine.low %v463_v56, %v464_v51 }
  0xe0   : > { %v825_v62 = vpop.permute.xlu0 %824 }
  0xe1   : > { %v919_v2 = vpop.permute.xlu1 %918  ;;  %v1000_v11 = vsel %vm369_vm0, %v720_v5, %v825_v62 }
  0xe2   : > { %v1020_v3 = vsel %vm1008_vm5, %v991_v1, %v919_v2 }
  0xe3   : > { %2086 = vmatmul.mubr.msk.f32.gmra.mxu0 %vm1045_vm4, %v1020_v3  ;;  %v523_v3 = vcombine.high %v466_v63, %v466_v63 }
  0xe4   : > { %v827_v6 = vpop.permute.xlu0 %826 }
  0xe5   : > { %v939_v8 = vpop.permute.xlu1 %938  ;;  %v1001_v10 = vsel %vm369_vm0, %v721_v4, %v827_v6  ;;  %v467_v6 = vld [vmem:[#allocation2 + $0xf8] sm:$0xf] }
  0xe6   : > { %v1030_v15 = vsel %vm1008_vm5, %v1001_v10, %v939_v8 }
  0xe8   : > { %v937_v12 = vpop.permute.xlu0 %936 }
  0xe9   : > { %v1029_v13 = vsel %vm1008_vm5, %v1000_v11, %v937_v12  ;;  %v811_v17 = vpop.permute.xlu1 %810  ;;  %v727_v11 = vcombine.low %v523_v3, %v467_v6  ;;  %v726_v12 = vcombine.low %v522_v7, %v466_v63 }
  0xea   : > { %2100 = vmatprep.mubr.msk.f32.mxu1 %vm1045_vm4, %v1029_v13  ;;  %v993_v29 = vsel %vm369_vm0, %v713_v23, %v811_v17 }
  0xeb   : > { %2101 = vmatmul.mubr.msk.f32.gmra.mxu1 %vm1045_vm4, %v1030_v15 }
  0xec   : > { %v809_v19 = vpop.permute.xlu0 %808 }
  0xed   : > { %v992_v21 = vsel %vm369_vm0, %v712_v14, %v809_v19  ;;  %v921_v24 = vpop.permute.xlu1 %920 }
  0xee   : > { %v1021_v25 = vsel %vm1008_vm5, %v992_v21, %v921_v24  ;;  %v1624_v21 = vmul.f32 %v2703_v20, %v2703_v20 }
  0xef   : > { %2088 = vmatprep.mubr.msk.f32.mxu0 %vm1045_vm4, %v1021_v25 }
  0xf0   : > { %v829_v28 = vpop.permute.xlu0 %828  ;;  %v1625_v22 = vsel %vm1477_vm6, %v1624_v21, 0.0 }
  0xf1   : > { %v923_v30 = vpop.permute.xlu1 %922  ;;  %v1002_v40 = vsel %vm369_vm0, %v722_v34, %v829_v28  ;;  %1626 = vadd.xlane.f32.xlu1 %v1625_v22 }
  0xf2   : > { %v1022_v32 = vsel %vm1008_vm5, %v993_v29, %v923_v30 }
  0xf3   : > { %2089 = vmatmul.mubr.msk.f32.gmra.mxu0 %vm1045_vm4, %v1022_v32  ;;  %v2711_v32 = vld [vmem:[%s2841_s5] ss:$0 sm:$0xff] }
  0xf4   : > { %v831_v35 = vpop.permute.xlu0 %830 }
  0xf5   : > { %v943_v37 = vpop.permute.xlu1 %942  ;;  %v1003_v38 = vsel %vm369_vm0, %v723_v33, %v831_v35 }
  0xf6   : > { %v1032_v44 = vsel %vm1008_vm5, %v1003_v38, %v943_v37 }
  0xf8   : > { %v941_v41 = vpop.permute.xlu0 %940 }
  0xf9   : > { %v1031_v42 = vsel %vm1008_vm5, %v1002_v40, %v941_v41  ;;  %v815_v46 = vpop.permute.xlu1 %814 }
  0xfa   : > { %2103 = vmatprep.mubr.msk.f32.mxu1 %vm1045_vm4, %v1031_v42  ;;  %v995_v57 = vsel %vm369_vm0, %v715_v49, %v815_v46 }
  0xfb   : > { %2104 = vmatmul.mubr.msk.f32.gmra.mxu1 %vm1045_vm4, %v1032_v44 }
  0xfc   : > { %v813_v47 = vpop.permute.xlu0 %812 }
  0xfd   : > { %v994_v48 = vsel %vm369_vm0, %v714_v43, %v813_v47  ;;  %v925_v50 = vpop.permute.xlu1 %924 }
  0xfe   : > { %v1023_v52 = vsel %vm1008_vm5, %v994_v48, %v925_v50 }
  0xff   : > { %2091 = vmatprep.mubr.msk.f32.mxu0 %vm1045_vm4, %v1023_v52 }
 0x100   : > { %v833_v54 = vpop.permute.xlu0 %832 }
 0x101   : > { %v927_v58 = vpop.permute.xlu1 %926  ;;  %v1004_v4 = vsel %vm369_vm0, %v724_v61, %v833_v54 }
 0x102   : > { %v1024_v59 = vsel %vm1008_vm5, %v995_v57, %v927_v58 }
 0x103   : > { %2092 = vmatmul.mubr.msk.f32.gmra.mxu0 %vm1045_vm4, %v1024_v59 }
 0x104   : > { %v835_v62 = vpop.permute.xlu0 %834 }
 0x105   : > { %v947_v1 = vpop.permute.xlu1 %946  ;;  %v1005_v2 = vsel %vm369_vm0, %v725_v60, %v835_v62 }
 0x106   : > { %v1034_v9 = vsel %vm1008_vm5, %v1005_v2, %v947_v1 }
 0x108   : > { %v945_v5 = vpop.permute.xlu0 %944 }
 0x109   : > { %v1033_v8 = vsel %vm1008_vm5, %v1004_v4, %v945_v5  ;;  %v839_v10 = vpop.permute.xlu1 %838 }
 0x10a   : > { %2106 = vmatprep.mubr.msk.f32.mxu1 %vm1045_vm4, %v1033_v8  ;;  %v1007_v14 = vsel %vm369_vm0, %v727_v11, %v839_v10 }
 0x10b   : > { %2107 = vmatmul.mubr.msk.f32.gmra.mxu1 %vm1045_vm4, %v1034_v9 }
 0x10c   : > { %v837_v13 = vpop.permute.xlu0 %836 }
 0x10d   : > { %v951_v15 = vpop.permute.xlu1 %950  ;;  %v1006_v16 = vsel %vm369_vm0, %v726_v12, %v837_v13  ;;  %vm1737_vm0 = vcmask 64512  }
 0x10e   : > { %v1036_v19 = vsel %vm1008_vm5, %v1007_v14, %v951_v15 }
 0x110   : > { %v949_v17 = vpop.permute.xlu0 %948 }
 0x111   : > { %v1035_v18 = vsel %vm1008_vm5, %v1006_v16, %v949_v17 }
 0x112   : > { %2109 = vmatprep.mubr.msk.f32.mxu1 %vm1045_vm4, %v1035_v18 }
 0x113   : > { %2110 = vmatmul.mubr.msk.f32.gmra.mxu1 %vm1045_vm4, %v1036_v19 }
 0x114   : > { %2114 = vmatprep.mubr.msk.f32.mxu1 %vm2318_vm14, %v2315_v0 }
 0x16f   : > { %v2072_v23 = vpop.f32.mrf.mxu0 }
 0x170   : > { %v1206_v35 = vadd.f32 %v2072_v23, %v2711_v32 }
 0x171   : > { %v1200_v24 = vpop.f32.mrf.mxu0 }
 0x172   : > { %v1201_v33 = vadd.f32 %v2711_v32, %v1200_v24  ;;  %v1340_v40 = vmax.f32 %v1206_v35, 0.0 }
 0x173   : > { %v2075_v25 = vpop.f32.mrf.mxu0 }
 0x174   : > { %v1339_v38 = vmax.f32 %v1201_v33, 0.0  ;;  %v1216_v41 = vadd.f32 %v2075_v25, %v2711_v32  ;;  %v1396_v51 = vcombine.high %v1340_v40, %v1340_v40 }
 0x175   : > { %v1210_v26 = vpop.f32.mrf.mxu0 }
 0x176   : > { %v1395_v45 = vcombine.high %v1339_v38, %v1339_v38  ;;  %v1211_v46 = vadd.f32 %v2711_v32, %v1210_v26  ;;  %v1342_v53 = vmax.f32 %v1216_v41, 0.0  ;;  %v1428_v63 = vcombine.low %v1340_v40, %v1396_v51 }
 0x178   : > { %v1427_v56 = vcombine.low %v1339_v38, %v1395_v45  ;;  %v1341_v57 = vmax.f32 %v1211_v46, 0.0  ;;  %v1398_v4 = vcombine.high %v1342_v53, %v1342_v53  ;;  %v1478_v51 = vsel %vm1477_vm6, %v1342_v53, 0.0 }
 0x17a   : > { %v1475_v8 = vadd.f32 %v1428_v63, %v1427_v56  ;;  %v1397_v9 = vcombine.high %v1341_v57, %v1341_v57 }
 0x17b   : > { %v2078_v27 = vpop.f32.mrf.mxu0 }
 0x17c   : > { %v1226_v48 = vadd.f32 %v2078_v27, %v2711_v32  ;;  %v1429_v27 = vcombine.low %v1341_v57, %v1397_v9 }
 0x17d   : > { %v1220_v28 = vpop.f32.mrf.mxu0 }
 0x17e   : > { %v1221_v39 = vadd.f32 %v2711_v32, %v1220_v28  ;;  %v1344_v59 = vmax.f32 %v1226_v48, 0.0 }
 0x180   : > { %v1343_v49 = vmax.f32 %v1221_v39, 0.0  ;;  %v1400_v13 = vcombine.high %v1344_v59, %v1344_v59 }
 0x182   : > { %v1399_v60 = vcombine.high %v1343_v49, %v1343_v49  ;;  %v1430_v28 = vcombine.low %v1398_v4, %v1343_v49 }
 0x183   : > { %v2081_v29 = vpop.f32.mrf.mxu0 }
 0x184   : > { %v1236_v47 = vadd.f32 %v2081_v29, %v2711_v32  ;;  %v1431_v14 = vcombine.low %v1399_v60, %v1344_v59 }
 0x185   : > { %v1230_v30 = vpop.f32.mrf.mxu0 }
 0x186   : > { %v1346_v58 = vmax.f32 %v1236_v47, 0.0  ;;  %v1231_v61 = vadd.f32 %v2711_v32, %v1230_v30  ;;  %v1486_v41 = vadd.f32 %v1431_v14, %v1430_v28 }
 0x188   : > { %v1402_v10 = vcombine.high %v1346_v58, %v1346_v58  ;;  %v1345_v15 = vmax.f32 %v1231_v61, 0.0 }
 0x18a   : > { %v1433_v29 = vcombine.low %v1346_v58, %v1402_v10  ;;  %v1432_v33 = vcombine.low %v1400_v13, %v1345_v15 }
 0x18b   : > { %v2096_v36 = vpop.f32.mrf.mxu1 }
 0x18c   : > { %v1286_v17 = vadd.f32 %v2096_v36, %v2711_v32 }
 0x18d   : > { %v2717_v42 = vpop.f32.mrf.mxu1 }
 0x18e   : > { %v1281_v57 = vadd.f32 %v2711_v32, %v2717_v42 }
 0x193   : > { %v2084_v31 = vpop.f32.mrf.mxu0 }
 0x194   : > { %v1246_v1 = vadd.f32 %v2084_v31, %v2711_v32  ;;  %v1401_v31 = vcombine.high %v1345_v15, %v1345_v15  ;;  %v1355_v15 = vmax.f32 %v1281_v57, 0.0 }
 0x195   : > { %v1240_v34 = vpop.f32.mrf.mxu0 }
 0x196   : > { %v1241_v43 = vadd.f32 %v2711_v32, %v1240_v34  ;;  %v1348_v18 = vmax.f32 %v1246_v1, 0.0  ;;  %v1488_v56 = vsel %vm1477_vm6, %v1401_v31, 0.0 }
 0x198   : > { %v1347_v54 = vmax.f32 %v1241_v43, 0.0  ;;  %v1404_v36 = vcombine.high %v1348_v18, %v1348_v18  ;;  %v2733_v43 = vmax.f32 %v1286_v17, 0.0 }
 0x19a   : > { %v1403_v5 = vcombine.high %v1347_v54, %v1347_v54  ;;  %v1435_v58 = vcombine.low %v1348_v18, %v1404_v36  ;;  %v1412_v60 = vcombine.high %v2733_v43, %v2733_v43 }
 0x19b   : > { %v2099_v50 = vpop.f32.mrf.mxu1 }
 0x19c   : > { %v1434_v22 = vcombine.low %v1347_v54, %v1403_v5  ;;  %v1296_v23 = vadd.f32 %v2099_v50, %v2711_v32  ;;  %v1487_v54 = vadd.f32 %v1486_v41, %v1432_v33 }
 0x19d   : > { %v1290_v62 = vpop.f32.mrf.mxu1 }
 0x19e   : > { %v1291_v11 = vadd.f32 %v2711_v32, %v1290_v62  ;;  %v1358_v45 = vmax.f32 %v1296_v23, 0.0 }
 0x1a0   : > { %v1357_v30 = vmax.f32 %v1291_v11, 0.0  ;;  %v1414_v1 = vcombine.high %v1358_v45, %v1358_v45 }
 0x1a2   : > { %v1413_v47 = vcombine.high %v1357_v30, %v1357_v30  ;;  %v1442_v9 = vcombine.low %v1412_v60, %v1357_v30 }
 0x1a3   : > { %v2087_v37 = vpop.f32.mrf.mxu0 }
 0x1a4   : > { %v1256_v55 = vadd.f32 %v2087_v37, %v2711_v32  ;;  %v1443_v53 = vcombine.low %v1413_v47, %v1358_v45 }
 0x1a5   : > { %v1250_v44 = vpop.f32.mrf.mxu0 }
 0x1a6   : > { %v1251_v52 = vadd.f32 %v2711_v32, %v1250_v44  ;;  %v1350_v6 = vmax.f32 %v1256_v55, 0.0  ;;  %v1496_v44 = vadd.f32 %v1434_v22, %v1433_v29 }
 0x1a8   : > { %v1349_v2 = vmax.f32 %v1251_v52, 0.0  ;;  %v1406_v24 = vcombine.high %v1350_v6, %v1350_v6  ;;  %v1476_v52 = vadd.f32 %v1475_v8, %v1429_v27  ;;  %v1489_v8 = vadd.f32 %v1488_v56, %v1487_v54 }
 0x1aa   : > { %v1405_v19 = vcombine.high %v1349_v2, %v1349_v2  ;;  %v1498_v61 = vsel %vm1477_vm6, %v1349_v2, 0.0  ;;  %v1479_v5 = vadd.f32 %v1478_v51, %v1476_v52 }
 0x1ab   : > { %v2102_v7 = vpop.f32.mrf.mxu1 }
 0x1ac   : > { %v1436_v38 = vcombine.low %v1405_v19, %v1350_v6  ;;  %v1306_v55 = vadd.f32 %v2102_v7, %v2711_v32 }
 0x1ad   : > { %v1300_v25 = vpop.f32.mrf.mxu1 }
 0x1ae   : > { %v1301_v39 = vadd.f32 %v2711_v32, %v1300_v25  ;;  %v1360_v6 = vmax.f32 %v1306_v55, 0.0  ;;  %v1490_v25 = vrot.slane %v1489_v8, 4 }
 0x1b0   : > { %v1359_v59 = vmax.f32 %v1301_v39, 0.0  ;;  %v1416_v19 = vcombine.high %v1360_v6, %v1360_v6 }
 0x1b2   : > { %v1444_v10 = vcombine.low %v1414_v1, %v1359_v59 }
 0x1b3   : > { %v2090_v3 = vpop.f32.mrf.mxu0 }
 0x1b4   : > { %v1266_v21 = vadd.f32 %v2090_v3, %v2711_v32  ;;  %v1497_v3 = vadd.f32 %v1496_v44, %v1435_v58 }
 0x1b5   : > { %v1260_v12 = vpop.f32.mrf.mxu0 }
 0x1b6   : > { %v1261_v16 = vadd.f32 %v2711_v32, %v1260_v12  ;;  %v1352_v40 = vmax.f32 %v1266_v21, 0.0  ;;  %v1499_v42 = vadd.f32 %v1498_v61, %v1497_v3  ;;  %v1415_v12 = vcombine.high %v1359_v59, %v1359_v59 }
 0x1b8   : > { %v1351_v26 = vmax.f32 %v1261_v16, 0.0  ;;  %v1408_v62 = vcombine.high %v1352_v40, %v1352_v40  ;;  %v1526_v16 = vadd.f32 %v1443_v53, %v1442_v9  ;;  %v1528_v28 = vsel %vm1477_vm6, %v1415_v12, 0.0 }
 0x1ba   : > { %v1407_v34 = vcombine.high %v1351_v26, %v1351_v26  ;;  %v1437_v35 = vcombine.low %v1406_v24, %v1351_v26  ;;  %v1508_v13 = vsel %vm1477_vm6, %v1408_v62, 0.0  ;;  %v1480_v24 = vrot.slane %v1479_v5, 4 }
 0x1bb   : > { %v2105_v37 = vpop.f32.mrf.mxu1  ;;  %v1500_v26 = vrot.slane %v1499_v42, 4  ;;  %v1527_v27 = vadd.f32 %v1526_v16, %v1444_v10 }
 0x1bc   : > { %v1438_v48 = vcombine.low %v1407_v34, %v1352_v40  ;;  %v1506_v49 = vadd.f32 %v1437_v35, %v1436_v38  ;;  %v1316_v7 = vadd.f32 %v2105_v37, %v2711_v32  ;;  %v1411_v34 = vcombine.high %v1355_v15, %v1355_v15 }
 0x1bd   : > { %v1310_v46 = vpop.f32.mrf.mxu1  ;;  %v1445_v35 = vcombine.low %v1360_v6, %v1416_v19  ;;  %v1481_v39 = vadd.f32 %v1480_v24, %v1479_v5  ;;  %v1491_v40 = vadd.f32 %v1490_v25, %v1489_v8  ;;  %v1529_v41 = vadd.f32 %v1528_v28, %v1527_v27 }
 0x1be   : > { %v1311_v50 = vadd.f32 %v2711_v32, %v1310_v46  ;;  %v1507_v4 = vadd.f32 %v1506_v49, %v1438_v48  ;;  %v1362_v21 = vmax.f32 %v1316_v7, 0.0  ;;  %v1501_v44 = vadd.f32 %v1500_v26, %v1499_v42 }
 0x1bf   : > { %v1441_v51 = vcombine.low %v1355_v15, %v1411_v34  ;;  %v1492_v55 = vrot.slane %v1491_v40, 2  ;;  %v1530_v56 = vrot.slane %v1529_v41, 4  ;;  %v1482_v59 = vrot.slane %v1481_v39, 2 }
 0x1c0   : > { %v1361_v63 = vmax.f32 %v1311_v50, 0.0  ;;  %v1509_v17 = vadd.f32 %v1508_v13, %v1507_v4  ;;  %v1418_v37 = vcombine.high %v1362_v21, %v1362_v21  ;;  %v1502_v60 = vrot.slane %v1501_v44, 2 }
 0x1c1   : > { %v1493_v6 = vadd.f32 %v1492_v55, %v1491_v40  ;;  %v1531_v7 = vadd.f32 %v1530_v56, %v1529_v41  ;;  %v1483_v42 = vadd.f32 %v1482_v59, %v1481_v39 }
 0x1c2   : > { %v1417_v14 = vcombine.high %v1361_v63, %v1361_v63  ;;  %v1510_v33 = vrot.slane %v1509_v17, 4  ;;  %v1447_v52 = vcombine.low %v1362_v21, %v1418_v37  ;;  %v1503_v10 = vadd.f32 %v1502_v60, %v1501_v44 }
 0x1c3   : > { %v2093_v11 = vpop.f32.mrf.mxu0  ;;  %v1532_v19 = vrot.slane %v1531_v7, 2 }
 0x1c4   : > { %v1276_v2 = vadd.f32 %v2093_v11, %v2711_v32  ;;  %v1446_v29 = vcombine.low %v1361_v63, %v1417_v14  ;;  %v1511_v49 = vadd.f32 %v1510_v33, %v1509_v17  ;;  %v1518_v63 = vsel %vm1477_vm6, %v2733_v43, 0.0 }
 0x1c5   : > { %v1270_v18 = vpop.f32.mrf.mxu0  ;;  %v1504_v24 = vrot.slane %v1503_v10, 1 }
 0x1c6   : > { %v1354_v22 = vmax.f32 %v1276_v2, 0.0  ;;  %v1271_v23 = vadd.f32 %v2711_v32, %v1270_v18  ;;  %v1536_v45 = vadd.f32 %v1446_v29, %v1445_v35  ;;  %v1512_v1 = vrot.slane %v1511_v49, 2 }
 0x1c7   : > { %v1494_v18 = vrot.slane %v1493_v6, 1  ;;  %v1533_v35 = vadd.f32 %v1532_v19, %v1531_v7 }
 0x1c8   : > { %v1410_v30 = vcombine.high %v1354_v22, %v1354_v22  ;;  %v1353_v31 = vmax.f32 %v1271_v23, 0.0  ;;  %v1537_v62 = vadd.f32 %v1536_v45, %v1447_v52  ;;  %v1513_v14 = vadd.f32 %v1512_v1, %v1511_v49 }
 0x1c9   : > { %v1484_v23 = vrot.slane %v1483_v42, 1  ;;  %v1495_v34 = vadd.f32 %v1494_v18, %v1493_v6  ;;  %v1627_v18 = vpop.xlane.xlu1 %1626 }
 0x1ca   : > { %v1409_v36 = vcombine.high %v1353_v31, %v1353_v31  ;;  %v1440_v46 = vcombine.low %v1354_v22, %v1410_v30  ;;  %v1514_v26 = vrot.slane %v1513_v14, 1  ;;  %v1628_v19 = vmax.f32 %v1627_v18, 1e-16 }
 0x1cb   : > { %v2108_v38 = vpop.f32.mrf.mxu1  ;;  %v1485_v39 = vadd.f32 %v1484_v23, %v1483_v42 }
 0x1cc   : > { %v1439_v47 = vcombine.low %v1353_v31, %v1409_v36  ;;  %v1326_v57 = vadd.f32 %v2108_v38, %v2711_v32  ;;  %v1505_v36 = vadd.f32 %v1504_v24, %v1503_v10  ;;  %v1515_v40 = vadd.f32 %v1514_v26, %v1513_v14 }
 0x1cd   : > { %v1320_v48 = vpop.f32.mrf.mxu1 }
 0x1ce   : > { %v1321_v50 = vadd.f32 %v2711_v32, %v1320_v48  ;;  %v1516_v54 = vadd.f32 %v1440_v46, %v1439_v47  ;;  %v1364_v8 = vmax.f32 %v1326_v57, 0.0  ;;  %v1557_v47 = vmul.f32 0.035714287, %v1495_v34 }
 0x1cf   : > { %v1534_v48 = vrot.slane %v1533_v35, 1  ;;  %v1559_v52 = vmul.f32 0.035714287, %v1515_v40 }
 0x1d0   : > { %v1363_v58 = vmax.f32 %v1321_v50, 0.0  ;;  %v1517_v61 = vadd.f32 %v1516_v54, %v1441_v51  ;;  %v1420_v21 = vcombine.high %v1364_v8, %v1364_v8  ;;  %v1558_v50 = vmul.f32 0.035714287, %v1505_v36 }
 0x1d1   : > { %v1556_v51 = vmul.f32 0.035714287, %v1485_v39  ;;  %v1565_v57 = vmul.f32 %v1557_v47, %v1557_v47  ;;  %v1535_v59 = vadd.f32 %v1534_v48, %v1533_v35 }
 0x1d2   : > { %v1538_v53 = vsel %vm1477_vm6, %v1363_v58, 0.0  ;;  %v1519_v3 = vadd.f32 %v1518_v63, %v1517_v61  ;;  %v1419_v2 = vcombine.high %v1363_v58, %v1363_v58  ;;  %v1566_v60 = vmul.f32 %v1558_v50, %v1558_v50 }
 0x1d3   : > { %v1539_v4 = vadd.f32 %v1538_v53, %v1537_v62  ;;  %v2111_v5 = vpop.f32.mrf.mxu1  ;;  %v1564_v61 = vmul.f32 %v1556_v51, %v1556_v51  ;;  %v1567_v63 = vmul.f32 %v1559_v52, %v1559_v52 }
 0x1d4   : > { %v1336_v9 = vadd.f32 %v2111_v5, %v2711_v32  ;;  %v1520_v11 = vrot.slane %v1519_v3, 4  ;;  %v1448_v27 = vcombine.low %v1419_v2, %v1364_v8 }
 0x1d5   : > { %v1540_v12 = vrot.slane %v1539_v4, 4  ;;  %v1330_v13 = vpop.f32.mrf.mxu1  ;;  %v1581_v5 = vsel %vm1580_vm7, %v1565_v57, %v1564_v61 }
 0x1d6   : > { %v1331_v43 = vadd.f32 %v2711_v32, %v1330_v13  ;;  %v1521_v15 = vadd.f32 %v1520_v11, %v1519_v3  ;;  %v1366_v17 = vmax.f32 %v1336_v9, 0.0  ;;  %v1583_v6 = vsel %vm1582_vm8, %v1566_v60, %v1581_v5 }
 0x1d7   : > { %v1541_v16 = vadd.f32 %v1540_v12, %v1539_v4  ;;  %v1561_v4 = vmul.f32 0.035714287, %v1535_v59  ;;  %v1585_v8 = vsel %vm1584_vm9, %v1567_v63, %v1583_v6  ;;  %v1736_v63 = vld [vmem:[%s329_s18] sm:$0xff]  ;;  %v1812_v6 = vlaneseq  ;;  %s2253_s18 = scalar_lea.vmem %s1872_s9, 64 }
 0x1d8   : > { %v1365_v22 = vmax.f32 %v1331_v43, 0.0  ;;  %v1522_v25 = vrot.slane %v1521_v15, 2  ;;  %v1422_v33 = vcombine.high %v1366_v17, %v1366_v17  ;;  %p2254_p11 = scmp.ne.s32.totalorder %s1872_s9, %s2253_s18 }
 0x1d9   : > { %v1542_v31 = vrot.slane %v1541_v16, 2  ;;  %v1569_v11 = vmul.f32 %v1561_v4, %v1561_v4 }
 0x1da   : > { %v1421_v28 = vcombine.high %v1365_v22, %v1365_v22  ;;  %v1449_v29 = vcombine.low %v1420_v21, %v1365_v22  ;;  %v1523_v30 = vadd.f32 %v1522_v25, %v1521_v15  ;;  %v1548_v45 = vsel %vm1477_vm6, %v1422_v33, 0.0  ;;  %p2255_p12 = pnand %p2254_p11, %p2399_p5 }
 0x1db   : > { %v1543_v44 = vadd.f32 %v1542_v31, %v1541_v16 }
 0x1dc   : > { %v1450_v32 = vcombine.low %v1421_v28, %v1366_v17  ;;  %v1546_v37 = vadd.f32 %v1449_v29, %v1448_v27  ;;  %v1524_v38 = vrot.slane %v1523_v30, 1  ;;  %p2256_p13 = pneg %p2255_p12 }
 0x1dd   : > { %v1544_v55 = vrot.slane %v1543_v44, 1 }
 0x1de   : > { %v1547_v41 = vadd.f32 %v1546_v37, %v1450_v32  ;;  %v1525_v46 = vadd.f32 %v1524_v38, %v1523_v30 }
 0x1df   : > { %v1545_v1 = vadd.f32 %v1544_v55, %v1543_v44 }
 0x1e0   : > { %v1549_v49 = vadd.f32 %v1548_v45, %v1547_v41  ;;  %v1560_v56 = vmul.f32 0.035714287, %v1525_v46 }
 0x1e1   : > { %v1562_v9 = vmul.f32 0.035714287, %v1545_v1  ;;  %v2319_v1 = vmov 0  }
 0x1e2   : > { %v1550_v54 = vrot.slane %v1549_v49, 4  ;;  %v1568_v53 = vmul.f32 %v1560_v56, %v1560_v56  ;;  %2170 = vset.pattern.permute.xlu0 %v2319_v1 }
 0x1e3   : > { %v1570_v14 = vmul.f32 %v1562_v9, %v1562_v9 }
 0x1e4   : > { %v1551_v58 = vadd.f32 %v1550_v54, %v1549_v49  ;;  %v1587_v42 = vsel %vm1586_vm10, %v1568_v53, %v1585_v8  ;;  %v1828_v53 = vld [vmem:[%s333_s21] sm:$0xf]  ;;  %s2259_s21 = scalar_lea.vmem %s2258_s20, 128 }
 0x1e5   : > { %v1589_v13 = vsel %vm1588_vm11, %v1569_v11, %v1587_v42  ;;  %p2261_p1 = scmp.lt.s32.totalorder %s2259_s21, %s2253_s18 }
 0x1e6   : > { %v1552_v62 = vrot.slane %v1551_v58, 2  ;;  %v1591_v43 = vsel %vm1590_vm12, %v1570_v14, %v1589_v13 }
 0x1e7   : > { %p2262_p2 = por %p2261_p1, %p2260_p0 }
 0x1e8   : > { %v1553_v3 = vadd.f32 %v1552_v62, %v1551_v58 }
 0x1e9   : > { %p2263_p3 = pnand %p2262_p2, %p2256_p13 }
 0x1ea   : > { %v1554_v7 = vrot.slane %v1553_v3, 1 }
 0x1ec   : > { %v1555_v10 = vadd.f32 %v1554_v7, %v1553_v3  ;;  %v1813_v7 = vand.u32 127, %v1812_v6 }
 0x1ee   : > { %v1563_v12 = vmul.f32 0.035714287, %v1555_v10  ;;  %vm1814_vm1 = vcmp.lt.s32.totalorder %v1813_v7, 5 }
 0x1f0   : > { %v1571_v2 = vmul.f32 %v1563_v12, %v1563_v12 }
 0x1f2   : > { %v1593_v15 = vsel %vm1592_vm13, %v1571_v2, %v1591_v43 }
 0x1f3   : > { %1595 = vadd.xlane.f32.xlu0 %v1593_v15 }
 0x27c   : > { %v1596_v16 = vpop.xlane.xlu0 %1595 }
 0x27d   : > { %v1597_v17 = vmax.f32 %v1596_v16, 1e-16 }
 0x27f   : > { %2241 = vrsqrt.f32 %v1597_v17 }
 0x280   : > { %2243 = vrsqrt.f32 %v1628_v19 }
 0x28c   : > { %v2242_v21 = vpop.eup %2241 }
 0x28d   : > { %v1600_v22 = vrot.slane %v2242_v21, 1  ;;  %v1601_v23 = vrot.slane %v2242_v21, 2  ;;  %v1602_v24 = vrot.slane %v2242_v21, 3  ;;  %v1603_v25 = vrot.slane %v2242_v21, 4  ;;  %v2244_v48 = vpop.eup %2243 }
 0x28e   : > { %v1604_v26 = vrot.slane %v2242_v21, 5  ;;  %v1605_v27 = vrot.slane %v2242_v21, 6  ;;  %v1606_v28 = vrot.slane %v2242_v21, 7  ;;  %v1615_v34 = vmul.f32 %v2242_v21, %v1556_v51 }
 0x28f   : > { %v1616_v29 = vmul.f32 %v1600_v22, %v1557_v47  ;;  %v1617_v30 = vmul.f32 %v1601_v23, %v1558_v50  ;;  %v1618_v31 = vmul.f32 %v1602_v24, %v1559_v52  ;;  %v1619_v33 = vmul.f32 %v1603_v25, %v1560_v56 }
 0x290   : > { %v1620_v35 = vmul.f32 %v1604_v26, %v1561_v4  ;;  %v1621_v36 = vmul.f32 %v1605_v27, %v1562_v9  ;;  %v1622_v38 = vmul.f32 %v1606_v28, %v1563_v12  ;;  %v1630_v55 = vmul.f32 %v2244_v48, %v2703_v20 }
 0x291   : > { %v1639_v32 = vrot.slane %v1616_v29, 7  ;;  %v1641_v37 = vrot.slane %v1617_v30, 6  ;;  %v1643_v40 = vrot.slane %v1618_v31, 5  ;;  %v1645_v44 = vrot.slane %v1619_v33, 4 }
 0x292   : > { %v1647_v46 = vrot.slane %v1620_v35, 3  ;;  %v1649_v49 = vrot.slane %v1621_v36, 2  ;;  %v1651_v51 = vrot.slane %v1622_v38, 1 }
 0x293   : > { %v1640_v39 = vsel %vm1580_vm7, %v1639_v32, %v1615_v34 }
 0x294   : > { %v1642_v41 = vsel %vm1582_vm8, %v1641_v37, %v1640_v39 }
 0x295   : > { %v1644_v45 = vsel %vm1584_vm9, %v1643_v40, %v1642_v41 }
 0x296   : > { %v1646_v47 = vsel %vm1586_vm10, %v1645_v44, %v1644_v45 }
 0x297   : > { %v1648_v50 = vsel %vm1588_vm11, %v1647_v46, %v1646_v47 }
 0x298   : > { %v1650_v52 = vsel %vm1590_vm12, %v1649_v49, %v1648_v50 }
 0x299   : > { %v1652_v54 = vsel %vm1592_vm13, %v1651_v51, %v1650_v52 }
 0x29a   : > { %2113 = vmatpush3.xpose.msra.mxu1 %v1652_v54 }
 0x29b   : > { %2117 = vmatprep.subr.mxu1 %v2315_v0 }
 0x29d   : > { %2115 = vmatmul.mubr.f32.vlgmr.msra.gmra.mxu1 %v1630_v55 }
 0x29e   : > { %2119 = vmatprep.mubr.msk.f32.mxu1 %vm2318_vm14, %v2315_v0  ;;  %2118 = vmatpush3.msra.mxu1 %v1736_v63 }
 0x35d   : > { %v1720_v56 = vpop.f32.mrf.mxu1 }
 0x35e   : > { %v1725_v57 = vsel %vm1724_vm15, %v1720_v56, -inf }
 0x35f   : > { %1726 = vmax.xlane.f32.xlu0 %v1725_v57  ;;  %v2116_v58 = vpop.f32.mrf.mxu1 }
 0x3e8   : > { %v1727_v59 = vpop.xlane.xlu0 %1726 }
 0x3e9   : > { %v1728_v60 = vsub.f32 %v1720_v56, %v1727_v59 }
 0x3eb   : > { %v1729_v61 = vmul.f32 1.442695, %v1728_v60 }
 0x3ed   : > { %2245 = vpow2.f32 %v1729_v61 }
 0x3fa   : > { %v2246_v62 = vpop.eup %2245 }
 0x3fb   : > { %v1731_v20 = vsel %vm1724_vm15, %v2246_v62, 0.0 }
 0x3fc   : > { %1732 = vadd.xlane.f32.xlu0 %v1731_v20 }
 0x412   : > { %1830 = vperm.xlu0 %2170, %v1828_v53  }
 0x485   : > { %v1733_v3 = vpop.xlane.xlu0 %1732 }
 0x486   : > { %2247 = vrcp.f32 %v1733_v3 }
 0x48d   : > { %v1831_v14 = vpop.permute.xlu0 %1830 }
 0x48e   : > { %vm1832_vm3 = vcmp.eq.s32.totalorder %v1813_v7, %v1831_v14 }
 0x48f   : > { %v2029_v2 = vsel %vm1832_vm3, 1.0, %v2315_v0 }
 0x493   : > { %v2248_v4 = vpop.eup %2247 }
 0x494   : > { %v1735_v5 = vmul.f32 %v2248_v4, %v2246_v62 }
 0x496   : > { %2120 = vmatmul.mubr.msk.f32.vlgmr.msra.gmra.mxu1 %vm1737_vm0, %v1735_v5 }
 0x556   : > { %v1807_v8 = vpop.f32.mrf.mxu1 }
 0x557   : > { %v1815_v9 = vsel %vm1814_vm1, %v1807_v8, -1e+30  ;;  %1811 = vst [vmem:[%s311_s22] sm:$0xf] %v1807_v8  ;;  %v1835_v16 = vmul.f32 %v2029_v2, %v1807_v8 }
 0x558   : > { %v2121_v42 = vpop.f32.mrf.mxu1  ;;  %v1816_v10 = vsel %vm1477_vm6, %v1815_v9, -inf }
 0x559   : > { %1817 = vmax.xlane.f32.xlu1 %v1816_v10  ;;  %v1836_v17 = vsel %vm1477_vm6, %v1835_v16, 0.0 }
 0x5e2   : > { %v1818_v11 = vpop.xlane.xlu1 %1817 }
 0x5e3   : > { %v1819_v12 = vsub.f32 %v1815_v9, %v1818_v11 }
 0x5e5   : > { %v1820_v13 = vmul.f32 1.442695, %v1819_v12 }
 0x5e7   : > { %2249 = vpow2.f32 %v1820_v13 }
 0x5f4   : > { %v2250_v43 = vpop.eup %2249 }
 0x5f5   : > { %v1822_v15 = vsel %vm1477_vm6, %v2250_v43, 0.0 }
 0x5f6   : > { %1823 = vadd.xlane.f32.xlu1 %v1822_v15 }
 0x5fa   : > { %1837 = vadd.xlane.f32.xlu1 %v1836_v17 }
 0x67f   : > { %v1824_v18 = vpop.xlane.xlu1 %1823 }
 0x680   : > { %2251 = vlog2.f32 %v1824_v18 }
 0x683   : > { %v1838_v23 = vpop.xlane.xlu1 %1837 }
 0x68d   : > { %v2252_v19 = vpop.eup %2251 }
 0x68e   : > { %v1826_v21 = vmul.f32 0.6931472, %v2252_v19 }
 0x690   : > { %v1827_v22 = vadd.f32 %v1826_v21, %v1818_v11 }
 0x692   : > { %v1839_v24 = vsub.f32 %v1827_v22, %v1838_v23 }
 0x694   : > { %v1840_v0 = vsel %vm406_vm2, %v1839_v24, 0.0 }
 0x695   : > { %1841 = vadd.xlane.f32.xlu1 %v1840_v0 }
 0x696   : > { %2266 = shalt.err (!%p2263_p3)
}
 0x697   : > { %s2267_s28 = scalar_lea.hbm %s1869_s16, 64  ;;  %s2271_s22 = scalar_lea.hbm %s2842_s6, 128 }
 0x698   : > { %p2268_p4 = scmp.ne.s32.totalorder %s1869_s16, %s2267_s28  ;;  %p2272_p9 = scmp.lt.s32.totalorder %s1869_s16, %s2842_s6 }
 0x699   : > { %p2273_p10 = scmp.lt.s32.totalorder %s2271_s22, %s2267_s28 }
 0x69a   : > { %p2269_p7 = pnand %p2268_p4, %p2399_p5 }
 0x69b   : > { %p2274_p11 = por %p2273_p10, %p2272_p9 }
 0x69c   : > { %p2270_p8 = pneg %p2269_p7 }
 0x69e   : > { %p2275_p12 = pnand %p2274_p11, %p2270_p8 }
 0x6a0   : > { %2278 = shalt.err (!%p2275_p12)
}
 0x6a1   : > { %2126 = dma.vmem_to_hbm [thread:$0]  (%p2399_p5), %s1872_s9, 64, %s1869_s16, %s1855_s17   ;;  %vm1852_vm2 = vcmask 0  }
 0x6a2   : > { %s336_s20 = scalar_lea.vmem %s2843_s7, %s2477_s13 }
 0x71e   : > { %v1842_v25 = vpop.xlane.xlu1 %1841 }
 0x71f   : > { %v1843_v26 = vrot.slane %v1842_v25, 4 }
 0x721   : > { %v1844_v27 = vadd.f32 %v1843_v26, %v1842_v25 }
 0x723   : > { %v1845_v28 = vrot.slane %v1844_v27, 2 }
 0x725   : > { %v1846_v29 = vadd.f32 %v1845_v28, %v1844_v27 }
 0x727   : > { %v1847_v30 = vrot.slane %v1846_v29, 1 }
 0x729   : > { %v1848_v31 = vadd.f32 %v1847_v30, %v1846_v29 }
 0x72b   : > { %2124 = vpush %v1848_v31 }
 0x75c   : > { %s2125_s15 = spop %2124 }
 0x75d   : > { %s1850_s21 = smul.f32 0.125, %s2125_s15 }
 0x75f   : > { %v1851_v33 = vstv %s1850_s21 }
 0x760   : > { %1853 = vst.msk [vmem:[%s336_s20] sm:$0x1] %vm1852_vm2, %v1851_v33 }
 0x761 PF: > { %p2132_p5 = scmp.ge.s32.totalorder %s2313_s27, 2  ;;  %s1886_s11 = sand.u32 1, %s2301_s24  }
 0x762   : > { %s1887_s9 = scalar_lea.sflag [#allocation4], %s1886_s11 }
 0x763   : > { %p2129_p13 = pnand %p2132_p5, %p2403_p6 }
 0x765   : > { %p2130_p0 = pneg %p2129_p13 }
 0x767   : > { %2296 = dma.done.wait (%p2130_p0), %s1887_s9, 64  }
 0x768   : > { %2298 = vsyncadd (%p2130_p0), %s1887_s9, 4294967232  ;;  %p18_p1 = scmp.ge.s32.totalorder %s2386_s30, 4   ;;  %s2846_s24 = smov %s2305_s25 }
 0x769   : > { %s2847_s25 = smov %s2309_s26  ;;  %s2848_s26 = smov %s2397_s10 }
 0x76a   : > { %s2849_s27 = smov %s2386_s30  ;;  %20 = sbr.rel (!%p18_p1) target bundleno = 3 (0x3), region = 100 }
 0x76f   :  { %1898 = vsyncpa [#allocation4], 1 }
 0x770   :  { %1900 = vsyncpa [#allocation4 + $0x1], 1 }

</bundles_post_ra>
